<compile_context>
chip_gen: v5e
topology: v5e:2x2
jax: 0.10.0
libtpu: 0.0.40
codegen_flags: <defaults>
</compile_context>

<pallas_src>
import functools
import numpy as np
import jax
import jax.numpy as jnp
from jax.experimental import pallas as pl
from jax.experimental.pallas import tpu as pltpu

D_MODEL = 128

# row indices of the packed (10, 128) bias slab used by the fused TAE/decoder kernel
_BQ, _BK, _BFC2, _BM1, _BM2, _OLNG, _OLNB, _BD1, _BD2, _BD3 = range(10)


# ---------------------------------------------------------------------------
# helpers
# ---------------------------------------------------------------------------
def _round_up(x, m):
    return ((x + m - 1) // m) * m


def _const_spec(shape):
    nd = len(shape)
    return pl.BlockSpec(shape, lambda i, _nd=nd: (0,) * _nd)


def _mm(a, w):
    """Explicit-dtype matmul: cast to the weight dtype, accumulate in f32.
    bf16 weights -> single MXU pass; f32 weights -> Precision.HIGHEST (exact f32)."""
    prec = jax.lax.Precision.HIGHEST if w.dtype == jnp.float32 else None
    return jnp.dot(a.astype(w.dtype), w,
                   preferred_element_type=jnp.float32, precision=prec)


def _bmm(spec, a, b, dtype):
    """Explicit-dtype batched einsum with f32 accumulation."""
    prec = jax.lax.Precision.HIGHEST if dtype == jnp.float32 else None
    return jnp.einsum(spec, a.astype(dtype), b.astype(dtype),
                      preferred_element_type=jnp.float32, precision=prec)


# ---------------------------------------------------------------------------
# Kernel 1: PixelSetEncoder (one tile of `tb` samples, all Npix pixels resident)
#   mlp1 (Linear+BN(folded)+ReLU x2) per pixel, single-pass masked mean/std pooling
#   over the contiguous Npix axis, concat mean||std, mlp2 (Linear+BN folded).
# ---------------------------------------------------------------------------
def pse_kernel(x_ref, m_ref, ex_ref,
               w1_ref, b1_ref, w2_ref, b2_ref, w3ab_ref, w3c_ref, b3_ref,
               out_ref):
    tb, npix, c_in = x_ref.shape
    x = x_ref[...].reshape(tb * npix, c_in)

    # mlp1 (eval-mode BatchNorm folded into weights/biases); bf16 operands, f32 accumulation
    h = jnp.maximum(_mm(x, w1_ref[...]) + b1_ref[...], 0.0)
    h = jnp.maximum(_mm(h, w2_ref[...]) + b2_ref[...], 0.0)          # (tb*Npix, 64)
    d1 = h.shape[-1]
    h3 = h.reshape(tb, npix, d1)                                     # contiguous pixel groups

    m = m_ref[...]                                                   # (tb, Npix), exact {0,1}
    mb = m[:, :, None]                                               # cheap lane splat
    msum = jnp.sum(m, axis=1, keepdims=True)                         # (tb, 1)

    # single-pass masked statistics: mean = s1/msum, var = (s2 - msum*mean^2)/(dof-1)
    hm = h3 * mb
    s1 = jnp.sum(hm, axis=1)                                         # (tb, 64)
    s2 = jnp.sum(hm * h3, axis=1)                                    # (tb, 64)
    mean = s1 / jnp.maximum(msum, 1.0)        # masked_mean (guard only hits padded rows)
    dof = jnp.where(msum == 1.0, 2.0, msum)   # reference: d[d == 1] = 2 (mask is exact {0,1})
    var = jnp.maximum(s2 - msum * mean * mean, 0.0) / (dof - 1.0)
    std = jnp.sqrt(var + 1e-31)                                      # masked_std

    # mlp2: Linear(132 -> 128) + BN(folded); mean||std fused into one K=128 operand
    ms = jnp.concatenate([mean, std], axis=-1)                       # (tb, 128)
    out_ref[...] = (_mm(ms, w3ab_ref[...])
                    + _mm(ex_ref[...], w3c_ref[...])
                    + b3_ref[...])


def pse_forward(pixels, mask, extra, prep, *, tb=256,
                vmem_limit_bytes=48 * 1024 * 1024):
    """PixelSetEncoder: (B,S,C,Npix) -> (B*S, 128), gridded over the B*S sample axis.

    The grid axis is "parallel" (both TensorCores on v7x, pipelined DMA everywhere).
    tb defaults to 256 rows and is clamped so the grid keeps >= ~4 steps when the batch
    allows it.  vmem_limit_bytes=48 MiB is safe on v7x (64 MiB physical VMEM); on
    v5e/v6e (128 MiB) it can be raised toward ~96-112 MiB together with a larger tb
    for production Npix.
    """
    B, S, C, Np = pixels.shape
    E = extra.shape[-1]
    BT = B * S
    tb = max(8, (tb // 8) * 8)                               # sublane-aligned sample tile
    tb = min(tb, max(8, _round_up(pl.cdiv(BT, 4), 8)))       # keep >= ~4 grid steps (v7x 2 TCs)
    BTp = _round_up(BT, tb)

    # Channel-last pixel rows for the mlp1 matmuls.
    # TODO(synk): emit channel-last pixels from the upstream producer to avoid this HBM pass.
    x = pixels.transpose(0, 1, 3, 2).reshape(BT, Np, C)
    m = mask.reshape(BT, Np).astype(jnp.float32)             # lane-dense mask block
    ex = extra.reshape(BT, E).astype(jnp.float32)
    if BTp != BT:                                            # padded rows fully masked, sliced off
        pad = BTp - BT
        x = jnp.pad(x, ((0, pad), (0, 0), (0, 0)))
        m = jnp.pad(m, ((0, pad), (0, 0)))
        ex = jnp.pad(ex, ((0, pad), (0, 0)))

    weights = (prep['w1'], prep['b1'], prep['w2'], prep['b2'],
               prep['w3ab'], prep['w3c'], prep['b3'])

    out = pl.pallas_call(
        pse_kernel,
        grid=(BTp // tb,),
        in_specs=[pl.BlockSpec((tb, Np, C), lambda i: (i, 0, 0)),
                  pl.BlockSpec((tb, Np), lambda i: (i, 0)),
                  pl.BlockSpec((tb, E), lambda i: (i, 0))]
                 + [_const_spec(w.shape) for w in weights],
        out_specs=pl.BlockSpec((tb, D_MODEL), lambda i: (i, 0)),
        out_shape=jax.ShapeDtypeStruct((BTp, D_MODEL), jnp.float32),
        compiler_params=pltpu.CompilerParams(
            dimension_semantics=("parallel",),
            vmem_limit_bytes=vmem_limit_bytes),
    )(x, m, ex, *weights)
    return out[:BT]


# ---------------------------------------------------------------------------
# Kernel 2 (fused): TemporalAttention head + mlp3 + out LayerNorm + decoder.
#   Gridded over the batch axis; every sample is independent.
# ---------------------------------------------------------------------------
def tae_dec_kernel(e_ref, pos_ref, lng_ref, lnb_ref,
                   wqk_ref, wfc2_ref, hmask_ref,
                   wm1_ref, wm2_ref, wd1_ref, wd2_ref, wd3_ref,
                   bias_ref, out_ref, *, n_head):
    x = e_ref[...]                                   # (b, S, D)
    b, S, D = x.shape
    cdt = wqk_ref.dtype                              # explicit matmul operand dtype
    bias = bias_ref[...]                             # (10, 128) packed small vectors

    # --- input LayerNorm (eps=1e-5) + sinusoidal positions ---
    mu = jnp.mean(x, axis=-1, keepdims=True)
    xc = x - mu
    var = jnp.mean(xc * xc, axis=-1, keepdims=True)
    enc = (xc * jax.lax.rsqrt(var + 1e-5)) * lng_ref[...] + lnb_ref[...] + pos_ref[...]
    enc2 = enc.reshape(b * S, D)

    # --- fused Q|K projection: one N=256 matmul (fills the 256-wide MXU on v6e/v7x) ---
    qk = _mm(enc2, wqk_ref[...])                                     # (b*S, 2D)
    qf = qk[:, :D] + bias[_BQ:_BQ + 1, :]
    kf = (qk[:, D:] + bias[_BK:_BK + 1, :]).reshape(b, S, D)

    # master query: temporal mean -> (BN folded into) fc2
    qm = jnp.mean(qf.reshape(b, S, D), axis=1)                       # (b, D)
    q2 = _mm(qm, wfc2_ref[...]) + bias[_BFC2:_BFC2 + 1, :]           # (b, D)

    # --- per-head scores: flash-style batched matmul, contraction on the minor axis.
    # hmask already carries the 1/sqrt(d_k) temperature and the 0/1 head-block pattern.
    q2h = q2[:, None, :] * hmask_ref[...][None, :, :]                # (b, H, D)
    sc = _bmm('bhd,bsd->bhs', q2h, kf, cdt)                          # (b, H, S)
    sc = sc - jnp.max(sc, axis=-1, keepdims=True)
    p = jnp.exp(sc)
    p = p / jnp.sum(p, axis=-1, keepdims=True)                       # softmax over sequence

    # --- head-batched value aggregation (values = full D-wide enc per head, reference
    # convention): att[b,h,:] = sum_s p[b,h,s] * enc[b,s,:]  (MXU, no enc replication)
    att = _bmm('bhs,bsd->bhd', p, enc, cdt)                          # (b, H, D)

    # mlp3 layer 1 (512->128, BN folded): consume the per-head layout directly by
    # accumulating per-head partial products against static slices of the weight slab.
    h1 = bias[_BM1:_BM1 + 1, :]
    for h in range(n_head):
        h1 = h1 + _mm(att[:, h, :], wm1_ref[h * D:(h + 1) * D, :])
    h1 = jnp.maximum(h1, 0.0)
    h2 = jnp.maximum(_mm(h1, wm2_ref[...]) + bias[_BM2:_BM2 + 1, :], 0.0)

    # out LayerNorm
    mu2 = jnp.mean(h2, axis=-1, keepdims=True)
    hc = h2 - mu2
    v2 = jnp.mean(hc * hc, axis=-1, keepdims=True)
    hn = (hc * jax.lax.rsqrt(v2 + 1e-5) * bias[_OLNG:_OLNG + 1, :]
          + bias[_OLNB:_OLNB + 1, :])

    # decoder mlp4 (BN folded); final layer padded to a lane-dense 128-wide slab
    d1 = jnp.maximum(_mm(hn, wd1_ref[...]) + bias[_BD1:_BD1 + 1, :wd1_ref.shape[1]], 0.0)
    d2 = jnp.maximum(_mm(d1, wd2_ref[...]) + bias[_BD2:_BD2 + 1, :wd2_ref.shape[1]], 0.0)
    out_ref[...] = _mm(d2, wd3_ref[...]) + bias[_BD3:_BD3 + 1, :]


def tae_forward(e, prep, *, tbb=8, vmem_limit_bytes=48 * 1024 * 1024):
    """Fused TAE head + decoder: (B, S, 128) -> (B, n_classes), gridded over the batch."""
    B, S, D = e.shape
    tbb = max(8, (tbb // 8) * 8)
    Bp = _round_up(B, tbb)
    if Bp != B:
        e = jnp.pad(e, ((0, Bp - B), (0, 0), (0, 0)))
    pos = prep['pos_table'][1:S + 1][None, :, :]          # positions 1..S, precomputed table

    kern = functools.partial(tae_dec_kernel, n_head=prep['n_head'])
    args = (e, pos, prep['lng'], prep['lnb'],
            prep['wqk'], prep['wfc2'], prep['hmask'],
            prep['wm1'], prep['wm2'], prep['wd1'], prep['wd2'], prep['wd3'],
            prep['bias'])
    out = pl.pallas_call(
        kern,
        grid=(Bp // tbb,),
        in_specs=[pl.BlockSpec((tbb, S, D), lambda i: (i, 0, 0))]
                 + [_const_spec(a.shape) for a in args[1:]],
        out_specs=pl.BlockSpec((tbb, D_MODEL), lambda i: (i, 0)),
        out_shape=jax.ShapeDtypeStruct((Bp, D_MODEL), jnp.float32),
        compiler_params=pltpu.CompilerParams(
            dimension_semantics=("parallel",),
            vmem_limit_bytes=vmem_limit_bytes),
    )(*args)
    return out[:B, :prep['n_classes']]


# ---------------------------------------------------------------------------
# Parameter construction and host-side preparation (BN folding, packing, padding)
# ---------------------------------------------------------------------------
def sinusoid_table(n_pos, d_hid, T=1000):
    pos = np.arange(n_pos)[:, None].astype(np.float64)
    hid = np.arange(d_hid)[None, :]
    angle = pos / np.power(float(T), 2 * (hid // 2) / float(d_hid))
    table = np.zeros((n_pos, d_hid), dtype=np.float64)
    table[:, 0::2] = np.sin(angle[:, 0::2])
    table[:, 1::2] = np.cos(angle[:, 1::2])
    return jnp.asarray(table, jnp.float32)


def init_params(key, *, input_dim=10, extra_size=4, n_classes=20):
    ks = iter(jax.random.split(key, 64))

    def lin(in_d, out_d):
        w = jax.random.normal(next(ks), (in_d, out_d), jnp.float32) / np.sqrt(in_d)
        b = 0.01 * jax.random.normal(next(ks), (1, out_d), jnp.float32)
        return w, b

    def bn(dim, eps=1e-5):
        gamma = jnp.ones((1, dim), jnp.float32)
        beta = jnp.zeros((1, dim), jnp.float32)
        rm = jnp.zeros((1, dim), jnp.float32)
        rv = jnp.ones((1, dim), jnp.float32)
        s = gamma / jnp.sqrt(rv + eps)
        t = beta - rm * s
        return s, t

    p = {}
    # PSE mlp1: linlayer(10,32), linlayer(32,64)
    p['w1'], p['b1'] = lin(input_dim, 32); p['s1'], p['t1'] = bn(32)
    p['w2'], p['b2'] = lin(32, 64);        p['s2'], p['t2'] = bn(64)
    # PSE mlp2: Linear(132,128) + BN(128)
    p['w3'], p['b3'] = lin(2 * 64 + extra_size, 128); p['s3'], p['t3'] = bn(128)
    # TAE
    p['ln_g'] = jnp.ones((1, 1, 128), jnp.float32)
    p['ln_b'] = jnp.zeros((1, 1, 128), jnp.float32)
    p['wq'], p['bq'] = lin(128, 128)
    p['wk'], p['bk'] = lin(128, 128)
    p['bns'], p['bnt'] = bn(128)
    p['wfc2'], p['bfc2'] = lin(128, 128)
    # TAE mlp3: [512,128,128]
    p['wm1'], p['bm1'] = lin(512, 128); p['sm1'], p['tm1'] = bn(128)
    p['wm2'], p['bm2'] = lin(128, 128); p['sm2'], p['tm2'] = bn(128)
    p['oln_g'] = jnp.ones((1, 128), jnp.float32)
    p['oln_b'] = jnp.zeros((1, 128), jnp.float32)
    # decoder mlp4: [128,64,32,n_classes]
    p['wd1'], p['bd1'] = lin(128, 64); p['sd1'], p['td1'] = bn(64)
    p['wd2'], p['bd2'] = lin(64, 32);  p['sd2'], p['td2'] = bn(32)
    p['wd3'], p['bd3'] = lin(32, n_classes)
    return p


def prepare_params(p, *, n_head=4, d_k=32, len_max_seq=24, T_period=1000,
                   matmul_dtype=jnp.bfloat16):
    """Host-side prep: fold eval-mode BatchNorm into the adjacent Linears, fuse/pad weights
    for the kernels, precompute the positional table, and pack the small (1,d) bias/gain
    vectors of the fused TAE/decoder kernel into a single (10, 128) slab.

    matmul_dtype selects the MXU operand dtype (bf16 with f32 accumulation by default;
    float32 switches every matmul to Precision.HIGHEST)."""
    D = D_MODEL
    mdt = matmul_dtype
    q = {}
    # ---- PixelSetEncoder ----------------------------------------------------
    q['w1'] = (p['w1'] * p['s1']).astype(mdt)
    q['b1'] = p['b1'] * p['s1'] + p['t1']
    q['w2'] = (p['w2'] * p['s2']).astype(mdt)
    q['b2'] = p['b2'] * p['s2'] + p['t2']
    w3 = p['w3'] * p['s3']
    q['w3ab'] = w3[:128].astype(mdt)                  # mean||std halves -> one K=128 operand
    q['w3c'] = w3[128:].astype(mdt)                   # extra-feature rows
    q['b3'] = p['b3'] * p['s3'] + p['t3']
    # ---- TemporalAttention head ----------------------------------------------
    q['lng'], q['lnb'] = p['ln_g'], p['ln_b']
    q['wqk'] = jnp.concatenate([p['wq'], p['wk']], axis=1).astype(mdt)   # fused Q|K (128,256)
    q['wfc2'] = (p['bns'].reshape(-1, 1) * p['wfc2']).astype(mdt)        # BN folded into fc2
    bfc2 = p['bnt'] @ p['wfc2'] + p['bfc2']
    hmask = np.zeros((n_head, D), np.float32)          # 0/1 head-block mask * 1/sqrt(d_k)
    for h in range(n_head):
        hmask[h, h * d_k:(h + 1) * d_k] = 1.0 / np.sqrt(d_k)
    q['hmask'] = jnp.asarray(hmask)
    q['wm1'] = (p['wm1'] * p['sm1']).astype(mdt)
    bm1 = p['bm1'] * p['sm1'] + p['tm1']
    q['wm2'] = (p['wm2'] * p['sm2']).astype(mdt)
    bm2 = p['bm2'] * p['sm2'] + p['tm2']
    # ---- decoder ---------------------------------------------------------------
    q['wd1'] = (p['wd1'] * p['sd1']).astype(mdt)
    bd1 = p['bd1'] * p['sd1'] + p['td1']
    q['wd2'] = (p['wd2'] * p['sd2']).astype(mdt)
    bd2 = p['bd2'] * p['sd2'] + p['td2']
    n_classes = p['wd3'].shape[1]
    q['wd3'] = jnp.pad(p['wd3'], ((0, 0), (0, D - n_classes))).astype(mdt)  # lane-dense slab
    bd3 = jnp.pad(p['bd3'], ((0, 0), (0, D - n_classes)))
    q['n_classes'] = int(n_classes)
    q['n_head'] = int(n_head)
    # ---- positional table (built once, not per forward call) -------------------
    q['pos_table'] = sinusoid_table(len_max_seq + 1, D, T_period)
    # ---- packed (10, 128) bias slab (row order must match _BQ.._BD3) ------------
    def pad_d(v):
        return jnp.pad(v, ((0, 0), (0, D - v.shape[1])))
    q['bias'] = jnp.concatenate(
        [pad_d(v) for v in (p['bq'], p['bk'], bfc2, bm1, bm2,
                            p['oln_g'], p['oln_b'], bd1, bd2, bd3)], axis=0)
    return q


def psetae_forward(pixels, mask, extra, prep, *, tb=256, tbb=8):
    B, S = pixels.shape[:2]
    e = pse_forward(pixels, mask, extra, prep, tb=tb).reshape(B, S, D_MODEL)
    return tae_forward(e, prep, tbb=tbb)


if __name__ == "__main__":
    key = jax.random.PRNGKey(0)
    kp, kx, km, ke = jax.random.split(key, 4)
    # B=3 (B=2 triggers a quirky `len(extra)==2` branch in the reference), seq=8,
    # 10 channels, 16 pixels per set, 4 extra features.
    B, S, C, Np, E = 3, 8, 10, 16, 4
    pixels = jax.random.normal(kx, (B, S, C, Np), jnp.float32)
    mask = (jax.random.uniform(km, (B, S, Np)) < 0.7).astype(jnp.float32)
    mask = mask.at[..., 0].set(1.0)                     # at least one valid pixel per sample
    extra = jax.random.normal(ke, (B, S, E), jnp.float32)

    params = init_params(kp, input_dim=C, extra_size=E, n_classes=20)
    prep = prepare_params(params)                       # BN folding / packing / padding on host
    out = psetae_forward(pixels, mask, extra, prep)
    out = jax.block_until_ready(out)
    assert out.shape == (B, 20) and out.dtype == jnp.float32
    assert bool(jnp.all(jnp.isfinite(out)))
    print("KERNEL_OK")
</pallas_src>

<mosaic_0001>
module attributes {stable_mosaic.version = 11 : i64} {
  func.func @pse_kernel(%arg0: i32, %arg1: memref<8x16x10xf32, #tpu.memory_space<vmem>>, %arg2: memref<8x16xf32, #tpu.memory_space<vmem>>, %arg3: memref<8x4xf32, #tpu.memory_space<vmem>>, %arg4: memref<10x32xbf16, #tpu.memory_space<vmem>>, %arg5: memref<1x32xf32, #tpu.memory_space<vmem>>, %arg6: memref<32x64xbf16, #tpu.memory_space<vmem>>, %arg7: memref<1x64xf32, #tpu.memory_space<vmem>>, %arg8: memref<128x128xbf16, #tpu.memory_space<vmem>>, %arg9: memref<4x128xbf16, #tpu.memory_space<vmem>>, %arg10: memref<1x128xf32, #tpu.memory_space<vmem>>, %arg11: memref<8x128xf32, #tpu.memory_space<vmem>>) attributes {dimension_semantics = [#tpu.dimension_semantics<parallel>], iteration_bounds = array<i64: 3>, scalar_prefetch = 0 : i64, scratch_operands = 0 : i64, tpu.core_type = #tpu.core_type<tc>, window_params = [{transform_indices = @transform_0, window_bounds = array<i64: 8, 16, 10>}, {transform_indices = @transform_1, window_bounds = array<i64: 8, 16>}, {transform_indices = @transform_2, window_bounds = array<i64: 8, 4>}, {pipeline_mode = #tpu.pipeline_mode<synchronous>, transform_indices = @transform_3, window_bounds = array<i64: 10, 32>}, {pipeline_mode = #tpu.pipeline_mode<synchronous>, transform_indices = @transform_4, window_bounds = array<i64: 1, 32>}, {pipeline_mode = #tpu.pipeline_mode<synchronous>, transform_indices = @transform_5, window_bounds = array<i64: 32, 64>}, {pipeline_mode = #tpu.pipeline_mode<synchronous>, transform_indices = @transform_6, window_bounds = array<i64: 1, 64>}, {pipeline_mode = #tpu.pipeline_mode<synchronous>, transform_indices = @transform_7, window_bounds = array<i64: 128, 128>}, {pipeline_mode = #tpu.pipeline_mode<synchronous>, transform_indices = @transform_8, window_bounds = array<i64: 4, 128>}, {pipeline_mode = #tpu.pipeline_mode<synchronous>, transform_indices = @transform_9, window_bounds = array<i64: 1, 128>}, {transform_indices = @transform_10, window_bounds = array<i64: 8, 128>}]} {
    %c0 = arith.constant 0 : index
    %c0_0 = arith.constant 0 : index
    %c0_1 = arith.constant 0 : index
    %0 = vector.load %arg1[%c0, %c0_0, %c0_1] : memref<8x16x10xf32, #tpu.memory_space<vmem>>, vector<8x16x10xf32>
    %1 = vector.shape_cast %0 : vector<8x16x10xf32> to vector<128x10xf32>
    %c0_2 = arith.constant 0 : index
    %c0_3 = arith.constant 0 : index
    %2 = vector.load %arg4[%c0_2, %c0_3] : memref<10x32xbf16, #tpu.memory_space<vmem>>, vector<10x32xbf16>
    %3 = arith.truncf %1 : vector<128x10xf32> to vector<128x10xbf16>
    %cst = arith.constant dense<0.000000e+00> : vector<128x32xf32>
    %4 = tpu.matmul %3, %2, %cst {dimension_numbers = #tpu.dot_dimension_numbers<[1], [0], [0], [1], [0, 0, 1, 1], [], []>} : vector<128x10xbf16>, vector<10x32xbf16>, vector<128x32xf32> -> vector<128x32xf32>
    %c0_4 = arith.constant 0 : index
    %c0_5 = arith.constant 0 : index
    %5 = vector.load %arg5[%c0_4, %c0_5] : memref<1x32xf32, #tpu.memory_space<vmem>>, vector<1x32xf32>
    %6 = vector.broadcast %5 : vector<1x32xf32> to vector<128x32xf32>
    %7 = arith.addf %4, %6 : vector<128x32xf32>
    %cst_6 = arith.constant 0.000000e+00 : f32
    %8 = vector.broadcast %cst_6 : f32 to vector<128x32xf32>
    %9 = arith.maximumf %7, %8 : vector<128x32xf32>
    %c0_7 = arith.constant 0 : index
    %c0_8 = arith.constant 0 : index
    %10 = vector.load %arg6[%c0_7, %c0_8] : memref<32x64xbf16, #tpu.memory_space<vmem>>, vector<32x64xbf16>
    %11 = arith.truncf %9 : vector<128x32xf32> to vector<128x32xbf16>
    %cst_9 = arith.constant dense<0.000000e+00> : vector<128x64xf32>
    %12 = tpu.matmul %11, %10, %cst_9 {dimension_numbers = #tpu.dot_dimension_numbers<[1], [0], [0], [1], [0, 0, 1, 1], [], []>} : vector<128x32xbf16>, vector<32x64xbf16>, vector<128x64xf32> -> vector<128x64xf32>
    %c0_10 = arith.constant 0 : index
    %c0_11 = arith.constant 0 : index
    %13 = vector.load %arg7[%c0_10, %c0_11] : memref<1x64xf32, #tpu.memory_space<vmem>>, vector<1x64xf32>
    %14 = vector.broadcast %13 : vector<1x64xf32> to vector<128x64xf32>
    %15 = arith.addf %12, %14 : vector<128x64xf32>
    %cst_12 = arith.constant 0.000000e+00 : f32
    %16 = vector.broadcast %cst_12 : f32 to vector<128x64xf32>
    %17 = arith.maximumf %15, %16 : vector<128x64xf32>
    %18 = vector.shape_cast %17 : vector<128x64xf32> to vector<8x16x64xf32>
    %c0_13 = arith.constant 0 : index
    %c0_14 = arith.constant 0 : index
    %19 = vector.load %arg2[%c0_13, %c0_14] : memref<8x16xf32, #tpu.memory_space<vmem>>, vector<8x16xf32>
    %20 = vector.shape_cast %19 : vector<8x16xf32> to vector<8x16x1xf32>
    %cst_15 = arith.constant dense<0.000000e+00> : vector<8xf32>
    %21 = vector.multi_reduction <add>, %19, %cst_15 [1] : vector<8x16xf32> to vector<8xf32>
    %22 = vector.shape_cast %21 : vector<8xf32> to vector<8x1xf32>
    %23 = vector.broadcast %20 : vector<8x16x1xf32> to vector<8x16x64xf32>
    %24 = arith.mulf %18, %23 : vector<8x16x64xf32>
    %cst_16 = arith.constant dense<0.000000e+00> : vector<8x64xf32>
    %25 = vector.multi_reduction <add>, %24, %cst_16 [1] : vector<8x16x64xf32> to vector<8x64xf32>
    %26 = arith.mulf %24, %18 : vector<8x16x64xf32>
    %cst_17 = arith.constant dense<0.000000e+00> : vector<8x64xf32>
    %27 = vector.multi_reduction <add>, %26, %cst_17 [1] : vector<8x16x64xf32> to vector<8x64xf32>
    %cst_18 = arith.constant 1.000000e+00 : f32
    %28 = vector.broadcast %cst_18 : f32 to vector<8x1xf32>
    %29 = arith.maximumf %22, %28 : vector<8x1xf32>
    %30 = vector.broadcast %29 : vector<8x1xf32> to vector<8x64xf32>
    %31 = arith.divf %25, %30 : vector<8x64xf32>
    %cst_19 = arith.constant 1.000000e+00 : f32
    %32 = vector.broadcast %cst_19 : f32 to vector<8x1xf32>
    %33 = arith.cmpf oeq, %22, %32 : vector<8x1xf32>
    %cst_20 = arith.constant 2.000000e+00 : f32
    %34 = vector.broadcast %cst_20 : f32 to vector<8x1xf32>
    %35 = arith.select %33, %34, %22 : vector<8x1xi1>, vector<8x1xf32>
    %36 = vector.broadcast %22 : vector<8x1xf32> to vector<8x64xf32>
    %37 = arith.mulf %36, %31 : vector<8x64xf32>
    %38 = arith.mulf %37, %31 : vector<8x64xf32>
    %39 = arith.subf %27, %38 : vector<8x64xf32>
    %cst_21 = arith.constant 0.000000e+00 : f32
    %40 = vector.broadcast %cst_21 : f32 to vector<8x64xf32>
    %41 = arith.maximumf %39, %40 : vector<8x64xf32>
    %cst_22 = arith.constant 1.000000e+00 : f32
    %42 = vector.broadcast %cst_22 : f32 to vector<8x1xf32>
    %43 = arith.subf %35, %42 : vector<8x1xf32>
    %44 = vector.broadcast %43 : vector<8x1xf32> to vector<8x64xf32>
    %45 = arith.divf %41, %44 : vector<8x64xf32>
    %cst_23 = arith.constant 9.99999979E-32 : f32
    %46 = vector.broadcast %cst_23 : f32 to vector<8x64xf32>
    %47 = arith.addf %45, %46 : vector<8x64xf32>
    %48 = math.sqrt %47 : vector<8x64xf32>
    %49 = tpu.concatenate %31, %48 in 1 : vector<8x64xf32>, vector<8x64xf32> -> vector<8x128xf32>
    %c0_24 = arith.constant 0 : index
    %c0_25 = arith.constant 0 : index
    %50 = vector.load %arg8[%c0_24, %c0_25] : memref<128x128xbf16, #tpu.memory_space<vmem>>, vector<128x128xbf16>
    %51 = arith.truncf %49 : vector<8x128xf32> to vector<8x128xbf16>
    %cst_26 = arith.constant dense<0.000000e+00> : vector<8x128xf32>
    %52 = tpu.matmul %51, %50, %cst_26 {dimension_numbers = #tpu.dot_dimension_numbers<[1], [0], [0], [1], [0, 0, 1, 1], [], []>} : vector<8x128xbf16>, vector<128x128xbf16>, vector<8x128xf32> -> vector<8x128xf32>
    %c0_27 = arith.constant 0 : index
    %c0_28 = arith.constant 0 : index
    %53 = vector.load %arg3[%c0_27, %c0_28] : memref<8x4xf32, #tpu.memory_space<vmem>>, vector<8x4xf32>
    %c0_29 = arith.constant 0 : index
    %c0_30 = arith.constant 0 : index
    %54 = vector.load %arg9[%c0_29, %c0_30] : memref<4x128xbf16, #tpu.memory_space<vmem>>, vector<4x128xbf16>
    %55 = arith.truncf %53 : vector<8x4xf32> to vector<8x4xbf16>
    %cst_31 = arith.constant dense<0.000000e+00> : vector<8x128xf32>
    %56 = tpu.matmul %55, %54, %cst_31 {dimension_numbers = #tpu.dot_dimension_numbers<[1], [0], [0], [1], [0, 0, 1, 1], [], []>} : vector<8x4xbf16>, vector<4x128xbf16>, vector<8x128xf32> -> vector<8x128xf32>
    %57 = arith.addf %52, %56 : vector<8x128xf32>
    %c0_32 = arith.constant 0 : index
    %c0_33 = arith.constant 0 : index
    %58 = vector.load %arg10[%c0_32, %c0_33] : memref<1x128xf32, #tpu.memory_space<vmem>>, vector<1x128xf32>
    %59 = vector.broadcast %58 : vector<1x128xf32> to vector<8x128xf32>
    %60 = arith.addf %57, %59 : vector<8x128xf32>
    %c0_34 = arith.constant 0 : index
    %c0_35 = arith.constant 0 : index
    %61 = vector.load %arg11[%c0_34, %c0_35] : memref<8x128xf32, #tpu.memory_space<vmem>>, vector<8x128xf32>
    tpu.vector_store %arg11[%c0_34, %c0_35], %60 {strides = array<i32>} : memref<8x128xf32, #tpu.memory_space<vmem>>, vector<8x128xf32>,
    return
  }
  func.func @transform_0(%arg0: i32) -> (i32, i32, i32) {
    %c0_i32 = arith.constant 0 : i32
    %c0_i32_0 = arith.constant 0 : i32
    %c0_i32_1 = arith.constant 0 : i32
    return %arg0, %c0_i32, %c0_i32_0 : i32, i32, i32
  }
  func.func @transform_1(%arg0: i32) -> (i32, i32) {
    %c0_i32 = arith.constant 0 : i32
    %c0_i32_0 = arith.constant 0 : i32
    return %arg0, %c0_i32 : i32, i32
  }
  func.func @transform_2(%arg0: i32) -> (i32, i32) {
    %c0_i32 = arith.constant 0 : i32
    %c0_i32_0 = arith.constant 0 : i32
    return %arg0, %c0_i32 : i32, i32
  }
  func.func @transform_3(%arg0: i32) -> (i32, i32) {
    %c0_i32 = arith.constant 0 : i32
    %c0_i32_0 = arith.constant 0 : i32
    %c0_i32_1 = arith.constant 0 : i32
    return %c0_i32, %c0_i32_0 : i32, i32
  }
  func.func @transform_4(%arg0: i32) -> (i32, i32) {
    %c0_i32 = arith.constant 0 : i32
    %c0_i32_0 = arith.constant 0 : i32
    %c0_i32_1 = arith.constant 0 : i32
    return %c0_i32, %c0_i32_0 : i32, i32
  }
  func.func @transform_5(%arg0: i32) -> (i32, i32) {
    %c0_i32 = arith.constant 0 : i32
    %c0_i32_0 = arith.constant 0 : i32
    %c0_i32_1 = arith.constant 0 : i32
    return %c0_i32, %c0_i32_0 : i32, i32
  }
  func.func @transform_6(%arg0: i32) -> (i32, i32) {
    %c0_i32 = arith.constant 0 : i32
    %c0_i32_0 = arith.constant 0 : i32
    %c0_i32_1 = arith.constant 0 : i32
    return %c0_i32, %c0_i32_0 : i32, i32
  }
  func.func @transform_7(%arg0: i32) -> (i32, i32) {
    %c0_i32 = arith.constant 0 : i32
    %c0_i32_0 = arith.constant 0 : i32
    %c0_i32_1 = arith.constant 0 : i32
    return %c0_i32, %c0_i32_0 : i32, i32
  }
  func.func @transform_8(%arg0: i32) -> (i32, i32) {
    %c0_i32 = arith.constant 0 : i32
    %c0_i32_0 = arith.constant 0 : i32
    %c0_i32_1 = arith.constant 0 : i32
    return %c0_i32, %c0_i32_0 : i32, i32
  }
  func.func @transform_9(%arg0: i32) -> (i32, i32) {
    %c0_i32 = arith.constant 0 : i32
    %c0_i32_0 = arith.constant 0 : i32
    %c0_i32_1 = arith.constant 0 : i32
    return %c0_i32, %c0_i32_0 : i32, i32
  }
  func.func @transform_10(%arg0: i32) -> (i32, i32) {
    %c0_i32 = arith.constant 0 : i32
    %c0_i32_0 = arith.constant 0 : i32
    return %arg0, %c0_i32 : i32, i32
  }
}

</mosaic_0001>

<bundles_post_ra>
// kernel: tpu_custom_call.1
= control target key start
LH: loop header
LB: loop body
LE: loop exit
PB: predicated region body
PF: predicated region fallthrough
CT: control target
= control target key end

     0   :  { %s2862_s0 = inlined_call_operand.vmem [shape: f32[24,16,10], index: 0, kind: input, shape index: {}]   ;;  %s2863_s1 = inlined_call_operand.vmem [shape: f32[24,16], index: 1, kind: input, shape index: {}]   ;;  %s2864_s2 = inlined_call_operand.vmem [shape: f32[24,4], index: 2, kind: input, shape index: {}]   ;;  %s2865_s3 = inlined_call_operand.vmem [shape: bf16[10,32], index: 3, kind: input, shape index: {}]   ;;  %s2866_s4 = inlined_call_operand.vmem [shape: f32[1,32], index: 4, kind: input, shape index: {}]   ;;  %s2867_s5 = inlined_call_operand.vmem [shape: bf16[32,64], index: 5, kind: input, shape index: {}]   ;;  %s2868_s6 = inlined_call_operand.vmem [shape: f32[1,64], index: 6, kind: input, shape index: {}]   ;;  %s2869_s7 = inlined_call_operand.vmem [shape: bf16[128,128], index: 7, kind: input, shape index: {}]   ;;  %s2870_s8 = inlined_call_operand.vmem [shape: bf16[4,128], index: 8, kind: input, shape index: {}]   ;;  %s2871_s9 = inlined_call_operand.vmem [shape: f32[1,128], index: 9, kind: input, shape index: {}]   ;;  %s2872_s10 = inlined_call_operand.hbm [shape: f32[24,128], index: 10, kind: output, shape index: {}]  }
   0x1   :  { %2877 = sst [smem:[#allocation5_spill]] %s2862_s0 }
   0x2   :  { %2878 = sst [smem:[#allocation6_spill]] %s2863_s1 }
   0x3   :  { %15 = vsyncpa [#allocation3], 0 }
   0x4   :  { %17 = vsyncpa [#allocation3 + $0x1], 0  ;;  %s1919_s13 = smov 0   ;;  %s1921_s14 = smov 0  }
   0x5   :  { %s1923_s15 = smov 0   ;;  %s1925_s16 = smov 0  }
   0x6 LB: > { %s1940_s17 = sadd.s32 4294967295, %s1861_s16   ;;  %s1608_s18 = sadd.s32 4294967294, %s1861_s16   ;;  %s1861_s16 = sphi %s1925_s16, %s2948_s16   ;;  %s1857_s15 = sphi %s1923_s15, %s2947_s15   ;;  %s1853_s14 = sphi %s1921_s14, %s2946_s14   ;;  %s1849_s13 = sphi %s1919_s13, %s2945_s13  }
   0x7   : > { %s1944_s19 = sadd.s32 1, %s1861_s16   ;;  %s255_s20 = sadd.s32 1, %s1857_s15 }
   0x8   : > { %s252_s21 = ssub.s32 %s1861_s16, %s1944_s19  ;;  %p265_p0 = scmp.ne.s32.totalorder %s1857_s15, %s1853_s14 }
   0x9   : > { %p253_p1 = scmp.eq.s32.totalorder %s252_s21, 0  ;;  %p266_p2 = scmp.eq.s32.totalorder %s1940_s17, 2 }
   0xa   : > { %p271_p3 = scmp.ne.s32.totalorder %s1853_s14, %s1849_s13  ;;  %p272_p4 = scmp.eq.s32.totalorder %s1608_s18, 2 }
   0xb   : > { %s1955_s22 = scalar_select %p253_p1, %s1857_s15, %s255_s20  }
   0xc   : > { %p1957_p5 = por %p266_p2, %p265_p0  ;;  %p1961_p6 = por %p272_p4, %p271_p3 }
   0xd   : > { %p1611_p7 = scmp.ge.s32.totalorder %s1861_s16, 1  ;;  %p335_p8 = scmp.lt.s32.totalorder %s1861_s16, 4 }
   0xf   : > { %p336_p9 = pnand %p1611_p7, %p335_p8 }
  0x10   : > { %s1974_s29 = sshll.u32 (!%p336_p9), %s1940_s17, 3  ;;  %s2881_s0 = sld [smem:[#allocation5_spill]] (!%p336_p9) }
  0x11   : > { %339 = sbr.rel (%p336_p9) target bundleno = 713 (0x2c9), region = 60  ;;  %p383_p10 = scmp.lt.s32.totalorder (!%p336_p9), %s1974_s29, 23 }
  0x12   : > { %p389_p11 = scmp.lt.s32.totalorder (!%p336_p9), %s1940_s17, 2  ;;  %s2882_s1 = sld [smem:[#allocation6_spill]] (!%p336_p9) }
  0x13   : > { %s1520_s12 = scalar_lea.hbm (!%p336_p9), %s2872_s10, %s1974_s29 }
  0x16   : > { %v1620_v0 = vld [vmem:[%s2865_s3] sm:$0xf]  ;;  %v1685_v1 = vld [vmem:[%s2865_s3] sm:$0x10]  ;;  %vm458_vm0 = vcmask 1044480   ;;  %s384_s30 = scalar_select %p383_p10, %s1974_s29, 23  ;;  %v647_v22 = vlaneseq }
  0x17   : > { %v1621_v2 = vor.u32 %v1685_v1, %v1620_v0  ;;  %vm433_vm1 = vcmask 80896   ;;  %s2950_s17 = smov (!%p389_p11, %s1940_s17), 2  ;;  %v1687_v32 = vld [vmem:[%s2867_s5 + $0x8] sm:$0xff]  ;;  %v1686_v34 = vld [vmem:[%s2867_s5] sm:$0xff]  ;;  %vm750_vm2 = vcmask 130048   ;;  %vm555_vm3 = vcmask 261120  }
  0x18   : > { %s1684_s11 = sshll.u32 %s384_s30, 4  ;;  %v2001_v23 = vshrl.u32 %v647_v22, 7  ;;  %s1616_s21 = sshll.u32 %s2950_s17, 3  ;;  %586 = vmatpush.bf16.msra.mxu1 %v1687_v32  ;;  %1697 = vmatpush.bf16.msra.mxu2 %v1687_v32  ;;  %v2042_v40 = vld [vmem:[%s2866_s4] ss:$0 sm:$0xff]  ;;  %vm2873_vm5 = vcmask 523264  }
  0x19   : > { %v460_v3 = vsel %vm458_vm0, %v1621_v2, 0  ;;  %s1981_s20 = scalar_lea.vmem %s2881_s0, %s1684_s11  ;;  %s392_s27 = scalar_lea.vmem %s2882_s1, %s1616_s21 }
  0x1a   : > { %469 = vmatpush.bf16.msra.mxu0 %v460_v3  ;;  %1696 = vmatpush.bf16.msra.mxu3 %v460_v3  ;;  %v398_v4 = vld [vmem:[%s1981_s20] sm:$0xff]  ;;  %v399_v5 = vld [vmem:[%s1981_s20 + $0x8] sm:$0xff]  ;;  %v408_v6 = vld [vmem:[%s1981_s20 + $0x50] sm:$0xff]  ;;  %v2029_v33 = vadd.s32 8, %v2001_v23  ;;  %s1524_s17 = sshll.u32 %s1520_s12, 4  ;;  %s1819_s11 = scalar_lea.hbm %s2872_s10, 24  ;;  %s1525_s17 = int_to_ptr.hbm [resolvable:$true] %s1524_s17 }
  0x1b   : > { %v416_v7 = vpack.c.bf16 %v399_v5, %v398_v4  ;;  %v409_v8 = vld [vmem:[%s1981_s20 + $0x58] sm:$0xff]  ;;  %v400_v10 = vld [vmem:[%s1981_s20 + $0x10] sm:$0xff]  ;;  %v410_v12 = vld [vmem:[%s1981_s20 + $0x60] sm:$0xff]  ;;  %1740 = vset.pattern.permute.xlu1 %v2001_v23  ;;  %1741 = vset.pattern.permute.xlu2 %v2001_v23  ;;  %s1813_s0 = sshra.s32 %s1525_s17, 4  ;;  %s1814_s0 = int_to_ptr.hbm [resolvable:$true] %s1813_s0 }
  0x1c   : > { %v421_v9 = vpack.c.bf16 %v409_v8, %v408_v6  ;;  %v401_v11 = vld [vmem:[%s1981_s20 + $0x18] sm:$0xff]  ;;  %v411_v13 = vld [vmem:[%s1981_s20 + $0x68] sm:$0xff]  ;;  %v402_v16 = vld [vmem:[%s1981_s20 + $0x20] sm:$0xff]  ;;  %1739 = vset.pattern.permute.xlu0 %v2001_v23  ;;  %587 = vmatpush.bf16.msra.mxu1 %v1686_v34  ;;  %s1815_s1 = scalar_lea.hbm %s1814_s0, 8  ;;  %p1820_p1 = scmp.lt.s32.totalorder %s1814_s0, %s2872_s10 }
  0x1d   : > { %1622 = vmatmul.msk.bf16.vlgmr.msra.gmra.mxu0 %vm433_vm1, %v416_v7  ;;  %v417_v14 = vpack.c.bf16 %v401_v11, %v400_v10  ;;  %v422_v15 = vpack.c.bf16 %v411_v13, %v410_v12  ;;  %v403_v17 = vld [vmem:[%s1981_s20 + $0x28] sm:$0xff]  ;;  %v412_v18 = vld [vmem:[%s1981_s20 + $0x70] sm:$0xff]  ;;  %v413_v19 = vld [vmem:[%s1981_s20 + $0x78] sm:$0xff]  ;;  %1698 = vmatpush.bf16.msra.mxu2 %v1686_v34  ;;  %p1816_p12 = scmp.ne.s32.totalorder %s1814_s0, %s1815_s1  ;;  %p1821_p2 = scmp.lt.s32.totalorder %s1819_s11, %s1815_s1 }
  0x1e   : > { %1627 = vmatmul.msk.bf16.vlgmr.msra.gmra.mxu3 %vm433_vm1, %v421_v9  ;;  %v418_v20 = vpack.c.bf16 %v403_v17, %v402_v16  ;;  %v423_v21 = vpack.c.bf16 %v413_v19, %v412_v18  ;;  %v404_v24 = vld [vmem:[%s1981_s20 + $0x30] sm:$0xff]  ;;  %v405_v25 = vld [vmem:[%s1981_s20 + $0x38] sm:$0xff]  ;;  %v406_v27 = vld [vmem:[%s1981_s20 + $0x40] sm:$0xff] }
  0x1f   : > { %v419_v26 = vpack.c.bf16 %v405_v25, %v404_v24  ;;  %v407_v28 = vld [vmem:[%s1981_s20 + $0x48] sm:$0xff]  ;;  %v2022_v30 = vld [vmem:[%s392_s27] sm:$0xff]  ;;  %s396_s20 = scalar_lea.vmem %s2864_s2, %s1616_s21  ;;  %s1863_s21 = smov 64  }
  0x20   : > { %v420_v29 = vpack.c.bf16 %v407_v28, %v406_v27  ;;  %v672_v31 = vperm.slane %v2022_v30, 2  ;;  %v659_v35 = vperm.slane %v2022_v30, 1  ;;  %v646_v36 = vperm.slane %v2022_v30, 0  ;;  %s379_s27 = sand.u32 1, %s1853_s14   ;;  %p1817_p13 = pnand %p1816_p12, %p1957_p5 }
  0x21   : > { %v751_v37 = vsel %vm750_vm2, %v2022_v30, 0.0  ;;  %v685_v39 = vperm.slane %v2022_v30, 3  ;;  %v698_v45 = vperm.slane %v2022_v30, 4  ;;  %v711_v54 = vperm.slane %v2022_v30, 5  ;;  %s1612_s28 = sshll.u32 %s379_s27, 3  ;;  %p1822_p3 = por %p1821_p2, %p1820_p1 }
  0x22   : > { %752 = vadd.xlane.f32.xlu0 %v751_v37  ;;  %v724_v5 = vperm.slane %v2022_v30, 6  ;;  %v737_v17 = vperm.slane %v2022_v30, 7  ;;  %s381_s25 = scalar_lea.vmem [#allocation2], %s1612_s28  ;;  %p1818_p0 = pneg %p1817_p13 }
  0x23   : > { %677 = vperm.xlu1 %1740, %v672_v31   ;;  %651 = vperm.xlu2 %1741, %v646_v36   ;;  %s1522_s26 = sshll.u32 %s381_s25, 4  ;;  %s1523_s26 = int_to_ptr.vmem [resolvable:$true] %s1522_s26 }
  0x24   : > { %p1823_p4 = pnand %p1822_p3, %p1818_p0 }
  0x2b   : > { %1742 = vset.pattern.permute.xlu1 %v2029_v33  ;;  %1743 = vset.pattern.permute.xlu2 %v2029_v33 }
  0x2d   : > { %1623 = vmatmul.msk.bf16.gmra.mxu0 %vm433_vm1, %v417_v14 }
  0x2e   : > { %1628 = vmatmul.msk.bf16.gmra.mxu3 %vm433_vm1, %v422_v15 }
  0x33   : > { %670 = vperm.xlu1 %1742, %v659_v35   ;;  %683 = vperm.xlu2 %1743, %v672_v31  }
  0x36   : > { %664 = vperm.xlu0 %1739, %v659_v35  }
  0x3b   : > { %657 = vperm.xlu1 %1742, %v646_v36   ;;  %1744 = vset.pattern.permute.xlu2 %v2001_v23 }
  0x3d   : > { %1624 = vmatmul.msk.bf16.gmra.mxu0 %vm433_vm1, %v418_v20 }
  0x3e   : > { %1629 = vmatmul.msk.bf16.gmra.mxu3 %vm433_vm1, %v423_v21  ;;  %1745 = vset.pattern.permute.xlu0 %v2029_v33 }
  0x43   : > { %696 = vperm.xlu1 %1742, %v685_v39   ;;  %690 = vperm.xlu2 %1744, %v685_v39  }
  0x46   : > { %735 = vperm.xlu0 %1745, %v724_v5  }
  0x4b   : > { %709 = vperm.xlu1 %1742, %v698_v45   ;;  %703 = vperm.xlu2 %1744, %v698_v45  }
  0x4d   : > { %1625 = vmatmul.msk.bf16.gmra.mxu0 %vm433_vm1, %v419_v26 }
  0x53   : > { %722 = vperm.xlu1 %1742, %v711_v54   ;;  %716 = vperm.xlu2 %1744, %v711_v54  }
  0x5b   : > { %1746 = vset.pattern.permute.xlu1 %v2001_v23  ;;  %729 = vperm.xlu2 %1744, %v724_v5  }
  0x5d   : > { %1626 = vmatmul.msk.bf16.gmra.mxu0 %vm433_vm1, %v420_v29 }
  0x63   : > { %742 = vperm.xlu1 %1746, %v737_v17   ;;  %1747 = vset.pattern.permute.xlu2 %v2029_v33 }
  0x6b   : > { %748 = vperm.xlu2 %1747, %v737_v17  }
  0x95   : > { %v2077_v37 = vpop.permute.xlu1 %677 }
  0x9a   : > { %v471_v38 = vpop.f32.mrf.mxu0 }
  0x9b   : > { %v472_v41 = vadd.f32 %v2042_v40, %v471_v38  ;;  %v652_v38 = vpop.permute.xlu2 %651 }
  0x9d   : > { %v511_v46 = vmax.f32 %v472_v41, 0.0  ;;  %v2083_v41 = vpop.xlane.xlu0 %752 }
  0x9e   : > { %vm1068_vm4 = vcmp.eq.f32.partialorder %v2083_v41, 1.0 }
  0xa1   : > { %v496_v42 = vpop.f32.mrf.mxu3 }
  0xa2   : > { %v473_v43 = vpop.f32.mrf.mxu0  ;;  %v497_v48 = vadd.f32 %v2042_v40, %v496_v42  ;;  %v2086_v42 = vmax.f32 %v2083_v41, 1.0 }
  0xa3   : > { %v474_v44 = vadd.f32 %v2042_v40, %v473_v43  ;;  %v2081_v33 = vpop.permute.xlu2 %683 }
  0xa4   : > { %v521_v51 = vmax.f32 %v497_v48, 0.0  ;;  %v2092_v45 = vrot.slane %v2086_v42, 1 }
  0xa5   : > { %v512_v47 = vmax.f32 %v474_v44, 0.0  ;;  %v2079_v39 = vpop.permute.xlu1 %670 }
  0xa6   : > { %vm968_vm10 = vweird.f32 %v2092_v45 }
  0xa7   : > { %v531_v49 = vpack.c.bf16 %v512_v47, %v511_v46  ;;  %v2097_v46 = vld [vmem:[%s2868_s6] ss:$0 sm:$0xff] }
  0xa9   : > { %v498_v50 = vpop.f32.mrf.mxu3  ;;  %1638 = vmatmul.msk.bf16.vlgmr.msra.gmra.mxu1 %vm555_vm3, %v531_v49 }
  0xaa   : > { %v499_v52 = vadd.f32 %v2042_v40, %v498_v50  ;;  %v476_v53 = vpop.f32.mrf.mxu0  ;;  %v2104_v50 = vrot.slane %v2086_v42, 6 }
  0xab   : > { %v477_v57 = vadd.f32 %v2042_v40, %v476_v53  ;;  %v2089_v44 = vpop.permute.xlu2 %690 }
  0xac   : > { %v522_v55 = vmax.f32 %v499_v52, 0.0  ;;  %v2110_v52 = vrot.slane %v2086_v42, 2  ;;  %vm1043_vm12 = vweird.f32 %v2104_v50 }
  0xad   : > { %v513_v61 = vmax.f32 %v477_v57, 0.0  ;;  %v658_v43 = vpop.permute.xlu1 %657 }
  0xae   : > { %v536_v56 = vpack.c.bf16 %v522_v55, %v521_v51  ;;  %vm983_vm2 = vweird.f32 %v2110_v52 }
  0xb0   : > { %1643 = vmatmul.msk.bf16.vlgmr.msra.gmra.mxu2 %vm555_vm3, %v536_v56  ;;  %v1069_v56 = vsel %vm1068_vm4, 2.0, %v2083_v41 }
  0xb1   : > { %v501_v58 = vpop.f32.mrf.mxu3 }
  0xb2   : > { %v478_v59 = vpop.f32.mrf.mxu0  ;;  %v502_v63 = vadd.f32 %v2042_v40, %v501_v58 }
  0xb3   : > { %v479_v60 = vadd.f32 %v2042_v40, %v478_v59  ;;  %v2117_v57 = vpop.permute.xlu2 %703 }
  0xb4   : > { %v523_v2 = vmax.f32 %v502_v63, 0.0 }
  0xb5   : > { %v514_v62 = vmax.f32 %v479_v60, 0.0  ;;  %v2106_v51 = vpop.permute.xlu1 %696 }
  0xb7   : > { %v532_v0 = vpack.c.bf16 %v514_v62, %v513_v61 }
  0xb9   : > { %v503_v1 = vpop.f32.mrf.mxu3  ;;  %1639 = vmatmul.msk.bf16.gmra.mxu1 %vm555_vm3, %v532_v0  ;;  %v2121_v0 = vadd.f32 -1.0, %v1069_v56 }
  0xba   : > { %v504_v3 = vadd.f32 %v2042_v40, %v503_v1  ;;  %v481_v4 = vpop.f32.mrf.mxu0 }
  0xbb   : > { %v482_v8 = vadd.f32 %v2042_v40, %v481_v4 }
  0xbc   : > { %v524_v6 = vmax.f32 %v504_v3, 0.0  ;;  %v2128_v3 = vrot.slane %v2086_v42, 3 }
  0xbd   : > { %v515_v12 = vmax.f32 %v482_v8, 0.0 }
  0xbe   : > { %v537_v7 = vpack.c.bf16 %v524_v6, %v523_v2 }
  0xc0   : > { %1644 = vmatmul.msk.bf16.gmra.mxu2 %vm555_vm3, %v537_v7 }
  0xc1   : > { %v506_v9 = vpop.f32.mrf.mxu3 }
  0xc2   : > { %v483_v10 = vpop.f32.mrf.mxu0  ;;  %v507_v14 = vadd.f32 %v2042_v40, %v506_v9 }
  0xc3   : > { %v484_v11 = vadd.f32 %v2042_v40, %v483_v10 }
  0xc4   : > { %v525_v18 = vmax.f32 %v507_v14, 0.0 }
  0xc5   : > { %v516_v13 = vmax.f32 %v484_v11, 0.0 }
  0xc7   : > { %v533_v15 = vpack.c.bf16 %v516_v13, %v515_v12  ;;  %v2136_v12 = vpop.permute.xlu1 %709 }
  0xc9   : > { %v508_v16 = vpop.f32.mrf.mxu3  ;;  %1640 = vmatmul.msk.bf16.gmra.mxu1 %vm555_vm3, %v533_v15 }
  0xca   : > { %v509_v19 = vadd.f32 %v2042_v40, %v508_v16  ;;  %v486_v20 = vpop.f32.mrf.mxu0 }
  0xcb   : > { %v487_v23 = vadd.f32 %v2042_v40, %v486_v20 }
  0xcc   : > { %v526_v21 = vmax.f32 %v509_v19, 0.0 }
  0xcd   : > { %v517_v26 = vmax.f32 %v487_v23, 0.0 }
  0xce   : > { %v538_v22 = vpack.c.bf16 %v526_v21, %v525_v18 }
  0xd0   : > { %1645 = vmatmul.msk.bf16.gmra.mxu2 %vm555_vm3, %v538_v22 }
  0xd2   : > { %v488_v24 = vpop.f32.mrf.mxu0 }
  0xd3   : > { %v489_v25 = vadd.f32 %v2042_v40, %v488_v24 }
  0xd5   : > { %v518_v27 = vmax.f32 %v489_v25, 0.0  ;;  %v717_v25 = vpop.permute.xlu2 %716 }
  0xd7   : > { %v534_v28 = vpack.c.bf16 %v518_v27, %v517_v26  ;;  %v2151_v26 = vrot.slane %v2086_v42, 4 }
  0xd9   : > { %1641 = vmatmul.msk.bf16.gmra.mxu1 %vm555_vm3, %v534_v28 }
  0xda   : > { %v491_v29 = vpop.f32.mrf.mxu0 }
  0xdb   : > { %v492_v30 = vadd.f32 %v2042_v40, %v491_v29 }
  0xdd   : > { %v519_v34 = vmax.f32 %v492_v30, 0.0 }
  0xe2   : > { %v493_v31 = vpop.f32.mrf.mxu0 }
  0xe3   : > { %v494_v32 = vadd.f32 %v2042_v40, %v493_v31  ;;  %v937_v40 = vrot.slane %v2086_v42, 5 }
  0xe5   : > { %v520_v35 = vmax.f32 %v494_v32, 0.0  ;;  %1751 = vrcp.f32 %v937_v40  ;;  %v1032_v60 = vand.u32 2147483647, %v937_v40  ;;  %v1034_v61 = vand.u32 2147483648, %v937_v40 }
  0xe6   : > { %1753 = vrcp.f32 %v2092_v45  ;;  %vm1028_vm6 = vweird.f32 %v937_v40 }
  0xe7   : > { %v535_v36 = vpack.c.bf16 %v520_v35, %v519_v34  ;;  %1755 = vrcp.f32 %v2104_v50  ;;  %v1035_v7 = vor.u32 1.1754944e-38, %v1034_v61  ;;  %vm2138_vm7 = vcmp.eq.f32.partialorder %v1032_v60, 8.507059e+37 }
  0xe8   : > { %1757 = vrcp.f32 %v2110_v52  ;;  %v972_v61 = vand.u32 2147483647, %v2092_v45 }
  0xe9   : > { %1642 = vmatmul.msk.bf16.gmra.mxu1 %vm555_vm3, %v535_v36  ;;  %1759 = vrcp.f32 %v2121_v0 }
  0xea   : > { %1761 = vrcp.f32 %v2128_v3  ;;  %vm2211_vm0 = vcmp.eq.f32.partialorder %v972_v61, 8.507059e+37 }
  0xeb   : > { %v2100_v48 = vpop.eup %1751  ;;  %1763 = vrcp.f32 %v2151_v26 }
  0xec   : > { %v1024_v53 = vmul.f32 %v2100_v48, %v937_v40  ;;  %v2114_v55 = vpop.eup %1753  ;;  %vm1029_vm8 = vweird.f32 %v2100_v48  ;;  %1765 = vrcp.f32 %v2086_v42 }
  0xed   : > { %v964_v1 = vmul.f32 %v2114_v55, %v2092_v45  ;;  %v2125_v2 = vpop.eup %1755  ;;  %vm2159_vm9 = vmor %vm1028_vm6, %vm1029_vm8  ;;  %vm969_vm11 = vweird.f32 %v2114_v55 }
  0xee   : > { %v1025_v59 = vsub.f32 1.0, %v1024_v53  ;;  %v2130_v5 = vpop.eup %1757  ;;  %v1039_v8 = vmul.f32 %v2125_v2, %v2104_v50  ;;  %vm1044_vm13 = vweird.f32 %v2125_v2  ;;  %vm2184_vm14 = vmor %vm968_vm10, %vm969_vm11  ;;  %vm1013_vm11 = vweird.f32 %v2151_v26 }
  0xef   : > { %v965_v14 = vsub.f32 1.0, %v964_v1  ;;  %v979_v20 = vmul.f32 %v2130_v5, %v2110_v52  ;;  %v2166_v36 = vpop.eup %1759  ;;  %vm2192_vm15 = vmor %vm1043_vm12, %vm1044_vm13  ;;  %vm984_vm3 = vweird.f32 %v2130_v5 }
  0xf0   : > { %v1026_v6 = vmul.f32 %v2100_v48, %v1025_v59  ;;  %v1040_v16 = vsub.f32 1.0, %v1039_v8  ;;  %vm2245_vm4 = vmor %vm983_vm2, %vm984_vm3 }
  0xf1   : > { %v966_v31 = vmul.f32 %v2114_v55, %v965_v14  ;;  %v980_v40 = vsub.f32 1.0, %v979_v20 }
  0xf2   : > { %v1027_v24 = vadd.f32 %v2100_v48, %v1026_v6  ;;  %v1041_v35 = vmul.f32 %v2125_v2, %v1040_v16  ;;  %v723_v6 = vpop.permute.xlu1 %722 }
  0xf3   : > { %v2178_v60 = vadd.f32 %v2114_v55, %v966_v31 }
  0xf4   : > { %v1031_v53 = vsel %vm2159_vm9, %v2100_v48, %v1027_v24  ;;  %v2189_v1 = vadd.f32 %v2125_v2, %v1041_v35 }
  0xf5   : > { %v2201_v14 = vsel %vm2138_vm7, %v1035_v7, %v1031_v53  ;;  %vm998_vm7 = vweird.f32 %v2128_v3 }
 0x126   : > { %v589_v47 = vpop.f32.mrf.mxu1 }
 0x127   : > { %v590_v49 = vadd.f32 %v2097_v46, %v589_v47 }
 0x129   : > { %v629_v54 = vmax.f32 %v590_v49, 0.0  ;;  %v2169_v49 = vpop.eup %1761 }
 0x12a   : > { %vm999_vm8 = vweird.f32 %v2169_v49 }
 0x12b   : > { %v754_v62 = vmul.f32 %v652_v38, %v629_v54  ;;  %vm2302_vm9 = vmor %vm998_vm7, %vm999_vm8  ;;  %vm1082_vm8 = vcmask 1042434  }
 0x12d   : > { %v843_v9 = vmul.f32 %v754_v62, %v629_v54  ;;  %v771_v17 = vsel %vm2873_vm5, %v754_v62, 0.0  ;;  %v974_v54 = vand.u32 2147483648, %v2092_v45 }
 0x12e   : > { %v591_v58 = vpop.f32.mrf.mxu1 }
 0x12f   : > { %v592_v63 = vadd.f32 %v2097_v46, %v591_v58  ;;  %v859_v27 = vsel %vm2873_vm5, %v843_v9, 0.0  ;;  %v975_v16 = vor.u32 1.1754944e-38, %v974_v54 }
 0x131   : > { %v630_v4 = vmax.f32 %v592_v63, 0.0 }
 0x133   : > { %v755_v10 = vmul.f32 %v658_v43, %v630_v4  ;;  %v614_v11 = vpop.f32.mrf.mxu2  ;;  %v665_v43 = vpop.permute.xlu0 %664 }
 0x134   : > { %v615_v15 = vadd.f32 %v2097_v46, %v614_v11  ;;  %v981_v11 = vmul.f32 %v2130_v5, %v980_v40 }
 0x135   : > { %v772_v18 = vsel %vm2873_vm5, %v755_v10, 0.0  ;;  %v844_v19 = vmul.f32 %v755_v10, %v630_v4  ;;  %v1047_v4 = vand.u32 2147483647, %v2104_v50  ;;  %v1049_v10 = vand.u32 2147483648, %v2104_v50 }
 0x136   : > { %v773_v21 = vadd.f32 %v772_v18, %v771_v17  ;;  %v639_v22 = vmax.f32 %v615_v15, 0.0  ;;  %v594_v23 = vpop.f32.mrf.mxu1  ;;  %v994_v17 = vmul.f32 %v2169_v49, %v2128_v3  ;;  %v971_v50 = vsel %vm2184_vm14, %v2114_v55, %v2178_v60 }
 0x137   : > { %v860_v28 = vsel %vm2873_vm5, %v844_v19, 0.0  ;;  %v595_v29 = vadd.f32 %v2097_v46, %v594_v23  ;;  %v1046_v23 = vsel %vm2192_vm15, %v2125_v2, %v2189_v1  ;;  %vm2219_vm1 = vcmp.eq.f32.partialorder %v1047_v4, 8.507059e+37 }
 0x138   : > { %v774_v32 = vrot.slane %v773_v21, 4  ;;  %v861_v34 = vadd.f32 %v860_v28, %v859_v27  ;;  %v764_v47 = vmul.f32 %v717_v25, %v639_v22  ;;  %v1050_v27 = vor.u32 1.1754944e-38, %v1049_v10 }
 0x139   : > { %v631_v38 = vmax.f32 %v595_v29, 0.0  ;;  %v2225_v28 = vadd.f32 %v2130_v5, %v981_v11  ;;  %v995_v48 = vsub.f32 1.0, %v994_v17  ;;  %vm953_vm14 = vweird.f32 %v2086_v42 }
 0x13a   : > { %v775_v56 = vadd.f32 %v774_v32, %v773_v21  ;;  %v862_v58 = vrot.slane %v861_v34, 4  ;;  %v853_v8 = vmul.f32 %v764_v47, %v639_v22  ;;  %v816_v13 = vsel %vm2873_vm5, %v764_v47, 0.0  ;;  %v2230_v32 = vpop.eup %1763 }
 0x13b   : > { %v616_v59 = vpop.f32.mrf.mxu2  ;;  %v756_v62 = vmul.f32 %v665_v43, %v631_v38  ;;  %v736_v24 = vpop.permute.xlu0 %735  ;;  %vm1014_vm12 = vweird.f32 %v2230_v32 }
 0x13c   : > { %v617_v63 = vadd.f32 %v2097_v46, %v616_v59  ;;  %v776_v18 = vrot.slane %v775_v56, 2  ;;  %v863_v19 = vadd.f32 %v862_v58, %v861_v34  ;;  %v904_v25 = vsel %vm2873_vm5, %v853_v8, 0.0  ;;  %vm2352_vm13 = vmor %vm1013_vm11, %vm1014_vm12 }
 0x13d   : > { %v845_v21 = vmul.f32 %v756_v62, %v631_v38  ;;  %v780_v29 = vsel %vm2873_vm5, %v756_v62, 0.0  ;;  %vm1088_vm11 = vcmask 1044484   ;;  %vm2876_vm12 = vcmask 1045509  }
 0x13e   : > { %v640_v45 = vmax.f32 %v617_v63, 0.0  ;;  %v596_v15 = vpop.f32.mrf.mxu1  ;;  %v777_v2 = vadd.f32 %v776_v18, %v775_v56  ;;  %v864_v34 = vrot.slane %v863_v19, 2  ;;  %v730_v63 = vpop.permute.xlu2 %729 }
 0x13f   : > { %v597_v20 = vadd.f32 %v2097_v46, %v596_v15  ;;  %v868_v47 = vsel %vm2873_vm5, %v845_v21, 0.0  ;;  %v989_v15 = vand.u32 2147483648, %v2110_v52 }
 0x140   : > { %v765_v22 = vmul.f32 %v723_v6, %v640_v45  ;;  %v778_v9 = vrot.slane %v777_v2, 1 }
 0x141   : > { %v632_v55 = vmax.f32 %v597_v20, 0.0 }
 0x142   : > { %v817_v30 = vsel %vm2873_vm5, %v765_v22, 0.0  ;;  %v854_v31 = vmul.f32 %v765_v22, %v640_v45  ;;  %v2250_v22 = vadd.f32 %v864_v34, %v863_v19  ;;  %v996_v19 = vmul.f32 %v2169_v49, %v995_v48 }
 0x143   : > { %v818_v35 = vadd.f32 %v817_v30, %v816_v13  ;;  %v757_v38 = vmul.f32 %v2079_v39, %v632_v55  ;;  %v619_v43 = vpop.f32.mrf.mxu2  ;;  %v987_v39 = vand.u32 2147483647, %v2110_v52  ;;  %v2259_v30 = vsel %vm2219_vm1, %v1050_v27, %v1046_v23 }
 0x144   : > { %v905_v40 = vsel %vm2873_vm5, %v854_v31, 0.0  ;;  %v620_v53 = vadd.f32 %v2097_v46, %v619_v43  ;;  %v986_v52 = vsel %vm2245_vm4, %v2130_v5, %v2225_v28  ;;  %v990_v27 = vor.u32 1.1754944e-38, %v989_v15 }
 0x145   : > { %v819_v54 = vrot.slane %v818_v35, 4  ;;  %v906_v58 = vadd.f32 %v905_v40, %v904_v25  ;;  %v781_v59 = vsel %vm2873_vm5, %v757_v38, 0.0  ;;  %v846_v60 = vmul.f32 %v757_v38, %v632_v55 }
 0x146   : > { %v782_v61 = vadd.f32 %v781_v59, %v780_v29  ;;  %v641_v56 = vmax.f32 %v620_v53, 0.0  ;;  %v599_v62 = vpop.f32.mrf.mxu1  ;;  %v2255_v55 = vsel %vm2211_vm0, %v975_v16, %v971_v50  ;;  %v2268_v16 = vadd.f32 %v778_v9, %v777_v2  ;;  %v2281_v53 = vpop.eup %1765 }
 0x147   : > { %v820_v1 = vadd.f32 %v819_v54, %v818_v35  ;;  %v907_v4 = vrot.slane %v906_v58, 4  ;;  %v869_v6 = vsel %vm2873_vm5, %v846_v60, 0.0  ;;  %v600_v8 = vadd.f32 %v2097_v46, %v599_v62 }
 0x148   : > { %v783_v10 = vrot.slane %v782_v61, 4  ;;  %v870_v11 = vadd.f32 %v869_v6, %v868_v47  ;;  %v766_v21 = vmul.f32 %v730_v63, %v641_v56  ;;  %vm2270_vm6 = vcmp.eq.f32.partialorder %v987_v39, 8.507059e+37 }
 0x149   : > { %v821_v17 = vrot.slane %v820_v1, 2  ;;  %v908_v18 = vadd.f32 %v907_v4, %v906_v58  ;;  %v633_v20 = vmax.f32 %v600_v8, 0.0  ;;  %v866_v5 = vrot.slane %v2250_v22, 1 }
 0x14a   : > { %v784_v13 = vadd.f32 %v783_v10, %v782_v61  ;;  %v871_v25 = vrot.slane %v870_v11, 4  ;;  %v855_v38 = vmul.f32 %v766_v21, %v641_v56  ;;  %v2278_v2 = vadd.f32 %v2169_v49, %v996_v19 }
 0x14b   : > { %v621_v29 = vpop.f32.mrf.mxu2  ;;  %v822_v31 = vadd.f32 %v821_v17, %v820_v1  ;;  %v758_v35 = vmul.f32 %v2077_v37, %v633_v20  ;;  %v909_v50 = vrot.slane %v908_v18, 2  ;;  %v825_v59 = vsel %vm2873_vm5, %v766_v21, 0.0 }
 0x14c   : > { %v785_v34 = vrot.slane %v784_v13, 2  ;;  %v622_v7 = vadd.f32 %v2097_v46, %v621_v29  ;;  %v872_v28 = vadd.f32 %v871_v25, %v870_v11  ;;  %v913_v56 = vsel %vm2873_vm5, %v855_v38, 0.0 }
 0x14d   : > { %v823_v54 = vrot.slane %v822_v31, 1  ;;  %v847_v58 = vmul.f32 %v758_v35, %v633_v20  ;;  %v910_v61 = vadd.f32 %v909_v50, %v908_v18  ;;  %v1002_v63 = vand.u32 2147483647, %v2128_v3 }
 0x14e   : > { %v642_v43 = vmax.f32 %v622_v7, 0.0  ;;  %v601_v47 = vpop.f32.mrf.mxu1  ;;  %v786_v37 = vadd.f32 %v785_v34, %v784_v13  ;;  %v873_v39 = vrot.slane %v872_v28, 2  ;;  %v789_v48 = vsel %vm2873_vm5, %v758_v35, 0.0 }
 0x14f   : > { %v602_v40 = vadd.f32 %v2097_v46, %v601_v47  ;;  %v1004_v11 = vand.u32 2147483648, %v2128_v3  ;;  %v824_v45 = vadd.f32 %v823_v54, %v822_v31  ;;  %v877_v15 = vsel %vm2873_vm5, %v847_v58, 0.0 }
 0x150   : > { %v767_v60 = vmul.f32 %v736_v24, %v642_v43  ;;  %v787_v6 = vrot.slane %v786_v37, 1  ;;  %v874_v29 = vadd.f32 %v873_v39, %v872_v28  ;;  %v1009_v7 = vmul.f32 %v2230_v32, %v2151_v26 }
 0x151   : > { %v634_v62 = vmax.f32 %v602_v40, 0.0  ;;  %v2308_v54 = vsel %vm2270_vm6, %v990_v27, %v986_v52  ;;  %v2311_v58 = vmul.f32 %v2201_v14, %v824_v45  ;;  %v1001_v3 = vsel %vm2302_vm9, %v2169_v49, %v2278_v2 }
 0x152   : > { %v826_v1 = vsel %vm2873_vm5, %v767_v60, 0.0  ;;  %v856_v4 = vmul.f32 %v767_v60, %v642_v43  ;;  %v788_v31 = vadd.f32 %v787_v6, %v786_v37  ;;  %v911_v37 = vrot.slane %v910_v61, 1 }
 0x153   : > { %v827_v8 = vadd.f32 %v826_v1, %v825_v59  ;;  %v759_v9 = vmul.f32 %v2081_v33, %v634_v62  ;;  %v624_v10 = vpop.f32.mrf.mxu2  ;;  %v743_v33 = vpop.permute.xlu1 %742  ;;  %v1005_v39 = vor.u32 1.1754944e-38, %v1004_v11  ;;  %vm1003_vm10 = vcmp.eq.f32.partialorder %v1002_v63, 8.507059e+37 }
 0x154   : > { %v914_v17 = vsel %vm2873_vm5, %v856_v4, 0.0  ;;  %v625_v18 = vadd.f32 %v2097_v46, %v624_v10  ;;  %v2318_v1 = vmul.f32 %v2255_v55, %v788_v31  ;;  %v1010_v23 = vsub.f32 1.0, %v1009_v7  ;;  %v749_v55 = vpop.permute.xlu2 %748 }
 0x155   : > { %v828_v20 = vrot.slane %v827_v8, 4  ;;  %v915_v21 = vadd.f32 %v914_v17, %v913_v56  ;;  %v790_v13 = vsel %vm2873_vm5, %v759_v9, 0.0  ;;  %v848_v25 = vmul.f32 %v759_v9, %v634_v62 }
 0x156   : > { %v791_v19 = vadd.f32 %v790_v13, %v789_v48  ;;  %v643_v34 = vmax.f32 %v625_v18, 0.0  ;;  %v604_v35 = vpop.f32.mrf.mxu1  ;;  %v875_v48 = vrot.slane %v874_v29, 1  ;;  %v2323_v14 = vadd.f32 %v866_v5, %v2250_v22 }
 0x157   : > { %v916_v50 = vrot.slane %v915_v21, 4  ;;  %v878_v38 = vsel %vm2873_vm5, %v848_v25, 0.0  ;;  %v605_v24 = vadd.f32 %v2097_v46, %v604_v35  ;;  %v829_v28 = vadd.f32 %v828_v20, %v827_v8 }
 0x158   : > { %v792_v47 = vrot.slane %v791_v19, 4  ;;  %v879_v40 = vadd.f32 %v878_v38, %v877_v15  ;;  %v768_v60 = vmul.f32 %v743_v33, %v643_v34  ;;  %v2326_v8 = vadd.f32 %v911_v37, %v910_v61 }
 0x159   : > { %v917_v59 = vadd.f32 %v916_v50, %v915_v21  ;;  %v635_v62 = vmax.f32 %v605_v24, 0.0  ;;  %v830_v27 = vrot.slane %v829_v28, 2  ;;  %v1090_v49 = vrot.slane %v2311_v58, 3 }
 0x15a   : > { %v793_v56 = vadd.f32 %v792_v47, %v791_v19  ;;  %v880_v4 = vrot.slane %v879_v40, 4  ;;  %v857_v9 = vmul.f32 %v768_v60, %v643_v34  ;;  %v2330_v15 = vsel %vm1003_vm10, %v1005_v39, %v1001_v3 }
 0x15b   : > { %v626_v52 = vpop.f32.mrf.mxu2  ;;  %v918_v2 = vrot.slane %v917_v59, 2  ;;  %v760_v63 = vmul.f32 %v2089_v44, %v635_v62  ;;  %v2332_v22 = vadd.f32 %v875_v48, %v874_v29  ;;  %v1078_v5 = vrot.slane %v2318_v1, 7 }
 0x15c   : > { %v627_v6 = vadd.f32 %v2097_v46, %v626_v52  ;;  %v794_v10 = vrot.slane %v793_v56, 2  ;;  %v1011_v61 = vmul.f32 %v2230_v32, %v1010_v23  ;;  %v831_v18 = vadd.f32 %v830_v27, %v829_v28 }
 0x15d   : > { %v881_v20 = vadd.f32 %v880_v4, %v879_v40  ;;  %v834_v21 = vsel %vm2873_vm5, %v768_v60, 0.0  ;;  %v919_v25 = vadd.f32 %v918_v2, %v917_v59  ;;  %v922_v44 = vsel %vm2873_vm5, %v857_v9, 0.0 }
 0x15e   : > { %v644_v11 = vmax.f32 %v627_v6, 0.0  ;;  %v606_v45 = vpop.f32.mrf.mxu1  ;;  %v795_v34 = vadd.f32 %v794_v10, %v793_v56  ;;  %v849_v29 = vmul.f32 %v760_v63, %v635_v62  ;;  %v2343_v50 = vadd.f32 %v2230_v32, %v1011_v61 }
 0x15f   : > { %v607_v17 = vadd.f32 %v2097_v46, %v606_v45  ;;  %v832_v38 = vrot.slane %v831_v18, 1  ;;  %v882_v24 = vrot.slane %v881_v20, 2  ;;  %v798_v43 = vsel %vm2873_vm5, %v760_v63, 0.0 }
 0x160   : > { %v769_v13 = vmul.f32 %v749_v55, %v644_v11  ;;  %v920_v60 = vrot.slane %v919_v25, 1  ;;  %v796_v56 = vrot.slane %v795_v34, 1  ;;  %v949_v9 = vmul.f32 %v2281_v53, %v2086_v42 }
 0x161   : > { %v636_v19 = vmax.f32 %v607_v17, 0.0  ;;  %v833_v4 = vadd.f32 %v832_v38, %v831_v18  ;;  %v883_v55 = vadd.f32 %v882_v24, %v881_v20  ;;  %v1019_v20 = vand.u32 2147483648, %v2151_v26 }
 0x162   : > { %v835_v35 = vsel %vm2873_vm5, %v769_v13, 0.0  ;;  %v858_v33 = vmul.f32 %v769_v13, %v644_v11  ;;  %v1016_v11 = vsel %vm2352_vm13, %v2230_v32, %v2343_v50  ;;  %v2364_v13 = vadd.f32 %v920_v60, %v919_v25 }
 0x163   : > { %v836_v7 = vadd.f32 %v835_v35, %v834_v21  ;;  %v761_v31 = vmul.f32 %v2106_v51, %v636_v19  ;;  %v886_v51 = vsel %vm2873_vm5, %v849_v29, 0.0  ;;  %v950_v21 = vsub.f32 1.0, %v949_v9 }
 0x164   : > { %v923_v28 = vsel %vm2873_vm5, %v858_v33, 0.0  ;;  %v797_v18 = vadd.f32 %v796_v56, %v795_v34  ;;  %vm954_vm15 = vweird.f32 %v2281_v53  ;;  %v957_v50 = vand.u32 2147483647, %v2086_v42 }
 0x165   : > { %v837_v47 = vrot.slane %v836_v7, 4  ;;  %v924_v40 = vadd.f32 %v923_v28, %v922_v44  ;;  %v799_v37 = vsel %vm2873_vm5, %v761_v31, 0.0  ;;  %v850_v59 = vmul.f32 %v761_v31, %v636_v19  ;;  %vm2387_vm0 = vmor %vm953_vm14, %vm954_vm15 }
 0x166   : > { %v800_v62 = vadd.f32 %v799_v37, %v798_v43  ;;  %v609_v3 = vpop.f32.mrf.mxu1  ;;  %v1017_v19 = vand.u32 2147483647, %v2151_v26  ;;  %v951_v33 = vmul.f32 %v2281_v53, %v950_v21  ;;  %v2370_v31 = vrot.slane %v2086_v42, 7 }
 0x167   : > { %v838_v48 = vadd.f32 %v837_v47, %v836_v7  ;;  %v925_v52 = vrot.slane %v924_v40, 4  ;;  %v887_v23 = vsel %vm2873_vm5, %v850_v59, 0.0  ;;  %v610_v27 = vadd.f32 %v2097_v46, %v609_v3 }
 0x168   : > { %v801_v6 = vrot.slane %v800_v62, 4  ;;  %v888_v2 = vadd.f32 %v887_v23, %v886_v51  ;;  %v959_v38 = vand.u32 2147483648, %v2086_v42  ;;  %v952_v28 = vadd.f32 %v2281_v53, %v951_v33 }
 0x169   : > { %v839_v10 = vrot.slane %v838_v48, 2  ;;  %v926_v63 = vadd.f32 %v925_v52, %v924_v40  ;;  %v637_v61 = vmax.f32 %v610_v27, 0.0  ;;  %v2380_v47 = vmul.f32 %v2259_v30, %v833_v4 }
 0x16a   : > { %v802_v45 = vadd.f32 %v801_v6, %v800_v62  ;;  %v889_v17 = vrot.slane %v888_v2, 4  ;;  %v884_v40 = vrot.slane %v883_v55, 1  ;;  %v2383_v37 = vmul.f32 %v2308_v54, %v797_v18 }
 0x16b   : > { %v927_v44 = vrot.slane %v926_v63, 2  ;;  %v840_v7 = vadd.f32 %v839_v10, %v838_v48  ;;  %v762_v25 = vmul.f32 %v2117_v57, %v637_v61  ;;  %v1020_v59 = vor.u32 1.1754944e-38, %v1019_v20 }
 0x16c   : > { %v803_v29 = vrot.slane %v802_v45, 2  ;;  %v890_v35 = vadd.f32 %v889_v17, %v888_v2  ;;  %vm1018_vm1 = vcmp.eq.f32.partialorder %v1017_v19, 8.507059e+37  ;;  %1767 = vrcp.f32 %v2370_v31 }
 0x16d   : > { %v928_v24 = vadd.f32 %v927_v44, %v926_v63  ;;  %v851_v51 = vmul.f32 %v762_v25, %v637_v61  ;;  %vm2392_vm2 = vcmp.eq.f32.partialorder %v957_v50, 8.507059e+37  ;;  %v960_v54 = vor.u32 1.1754944e-38, %v959_v38 }
 0x16e   : > { %v804_v32 = vadd.f32 %v803_v29, %v802_v45  ;;  %v611_v34 = vpop.f32.mrf.mxu1  ;;  %v891_v26 = vrot.slane %v890_v35, 2  ;;  %v956_v39 = vsel %vm2387_vm0, %v2281_v53, %v952_v28  ;;  %v1093_v48 = vrot.slane %v2380_v47, 2 }
 0x16f   : > { %v612_v43 = vadd.f32 %v2097_v46, %v611_v34  ;;  %v841_v46 = vrot.slane %v840_v7, 1  ;;  %v929_v62 = vrot.slane %v928_v24, 1  ;;  %v2401_v52 = vadd.f32 %v884_v40, %v883_v55 }
 0x170   : > { %v805_v60 = vrot.slane %v804_v32, 1  ;;  %v892_v3 = vadd.f32 %v891_v26, %v890_v35  ;;  %v1081_v23 = vrot.slane %v2383_v37, 6  ;;  %v2404_v27 = vsel %vm1018_vm1, %v1020_v59, %v1016_v11 }
 0x171   : > { %v638_v56 = vmax.f32 %v612_v43, 0.0  ;;  %v807_v6 = vsel %vm2873_vm5, %v762_v25, 0.0  ;;  %v842_v10 = vadd.f32 %v841_v46, %v840_v7  ;;  %v961_v53 = vsel %vm2392_vm2, %v960_v54, %v956_v39 }
 0x172   : > { %v806_v4 = vadd.f32 %v805_v60, %v804_v32  ;;  %v1768_v45 = vpop.eup %1767  ;;  %v2411_v55 = vadd.f32 %v929_v62, %v928_v24  ;;  %v893_v17 = vrot.slane %v892_v3, 1  ;;  %v1062_v61 = vand.u32 2147483647, %v2370_v31 }
 0x173   : > { %v763_v42 = vmul.f32 %v2136_v12, %v638_v56  ;;  %v895_v12 = vsel %vm2873_vm5, %v851_v51, 0.0  ;;  %v1054_v44 = vmul.f32 %v1768_v45, %v2370_v31  ;;  %vm1058_vm3 = vweird.f32 %v2370_v31 }
 0x174   : > { %v1007_v19 = vmul.f32 %v2330_v15, %v806_v4  ;;  %v962_v29 = vmul.f32 %v961_v53, %v2268_v16  ;;  %v1064_v35 = vand.u32 2147483648, %v2370_v31  ;;  %vm1079_vm4 = vcmask 1041409  }
 0x175   : > { %v808_v2 = vsel %vm2873_vm5, %v763_v42, 0.0  ;;  %v852_v9 = vmul.f32 %v763_v42, %v638_v56  ;;  %v1055_v7 = vsub.f32 1.0, %v1054_v44  ;;  %vm1059_vm6 = vweird.f32 %v1768_v45 }
 0x176   : > { %v809_v63 = vadd.f32 %v808_v2, %v807_v6  ;;  %v2420_v32 = vadd.f32 %v893_v17, %v892_v3  ;;  %vm2422_vm7 = vcmp.eq.f32.partialorder %v1062_v61, 8.507059e+37  ;;  %v2427_v34 = vrot.slane %v2121_v0, 1  ;;  %vm2433_vm9 = vmor %vm1058_vm3, %vm1059_vm6 }
 0x177   : > { %v896_v11 = vsel %vm2873_vm5, %v852_v9, 0.0  ;;  %v1056_v16 = vmul.f32 %v1768_v45, %v1055_v7  ;;  %v1152_v38 = vmul.f32 %v2166_v36, %v2121_v0  ;;  %v1084_v24 = vrot.slane %v1007_v19, 5 }
 0x178   : > { %v810_v21 = vrot.slane %v809_v63, 4  ;;  %v897_v18 = vadd.f32 %v896_v11, %v895_v12  ;;  %v1065_v43 = vor.u32 1.1754944e-38, %v1064_v35  ;;  %v1080_v28 = vsel %vm1079_vm4, %v1078_v5, %v962_v29 }
 0x179   : > { %v2441_v40 = vrot.slane %v2121_v0, 2  ;;  %v1057_v59 = vadd.f32 %v1768_v45, %v1056_v16  ;;  %vm1085_vm10 = vcmask 1043459   ;;  %v1153_v57 = vsub.f32 1.0, %v1152_v38 }
 0x17a   : > { %v811_v20 = vadd.f32 %v810_v21, %v809_v63  ;;  %v898_v33 = vrot.slane %v897_v18, 4  ;;  %v1083_v56 = vsel %vm1082_vm8, %v1081_v23, %v1080_v28  ;;  %1769 = vrcp.f32 %v2427_v34 }
 0x17b   : > { %v1061_v46 = vsel %vm2433_vm9, %v1768_v45, %v1057_v59  ;;  %vm2875_vm13 = vcmask 1046534   ;;  %v1086_v1 = vsel %vm1085_vm10, %v1084_v24, %v1083_v56  ;;  %v2449_v5 = vrot.slane %v2121_v0, 3 }
 0x17c   : > { %v812_v15 = vrot.slane %v811_v20, 2  ;;  %v899_v50 = vadd.f32 %v898_v33, %v897_v18  ;;  %v1154_v51 = vmul.f32 %v2166_v36, %v1153_v57  ;;  %1771 = vrcp.f32 %v2441_v40 }
 0x17d   : > { %vm2874_vm14 = vcmask 1047559   ;;  %vm1156_vm15 = vweird.f32 %v2121_v0  ;;  %vm1157_vm0 = vweird.f32 %v2166_v36  ;;  %v1066_v62 = vsel %vm2422_vm7, %v1065_v43, %v1061_v46 }
 0x17e   : > { %v813_v37 = vadd.f32 %v812_v15, %v811_v20  ;;  %v900_v60 = vrot.slane %v899_v50, 2  ;;  %v1160_v3 = vand.u32 2147483647, %v2121_v0  ;;  %v1162_v42 = vand.u32 2147483648, %v2121_v0  ;;  %vm2481_vm1 = vmor %vm1156_vm15, %vm1157_vm0 }
 0x17f   : > { %v1067_v23 = vmul.f32 %v1066_v62, %v842_v10  ;;  %v2461_v4 = vrot.slane %v2121_v0, 4  ;;  %v2464_v6 = vrot.slane %v2121_v0, 5  ;;  %v2469_v9 = vrot.slane %v2121_v0, 6 }
 0x180   : > { %v814_v31 = vrot.slane %v813_v37, 1  ;;  %v901_v54 = vadd.f32 %v900_v60, %v899_v50  ;;  %v2466_v2 = vpop.eup %1769  ;;  %v1155_v12 = vadd.f32 %v2166_v36, %v1154_v51  ;;  %v1175_v63 = vand.u32 2147483647, %v2427_v34 }
 0x181   : > { %1773 = vrcp.f32 %v2449_v5  ;;  %v1167_v45 = vmul.f32 %v2466_v2, %v2427_v34  ;;  %v1177_v17 = vand.u32 2147483648, %v2427_v34  ;;  %vm2490_vm2 = vcmp.eq.f32.partialorder %v1160_v3, 8.507059e+37 }
 0x182   : > { %v815_v30 = vadd.f32 %v814_v31, %v813_v37  ;;  %v2488_v11 = vpop.eup %1771  ;;  %v902_v61 = vrot.slane %v901_v54, 1  ;;  %v1163_v18 = vor.u32 1.1754944e-38, %v1162_v42  ;;  %vm1171_vm3 = vweird.f32 %v2427_v34 }
 0x183   : > { %v1096_v44 = vrot.slane %v1067_v23, 1  ;;  %v1168_v19 = vsub.f32 1.0, %v1167_v45  ;;  %v1182_v29 = vmul.f32 %v2488_v11, %v2441_v40  ;;  %v1159_v20 = vsel %vm2481_vm1, %v2166_v36, %v1155_v12 }
 0x184   : > { %v1022_v39 = vmul.f32 %v2404_v27, %v815_v30  ;;  %v2475_v27 = vrot.slane %v2121_v0, 7  ;;  %vm2504_vm6 = vcmp.eq.f32.partialorder %v1175_v63, 8.507059e+37  ;;  %v1192_v7 = vand.u32 2147483648, %v2441_v40 }
 0x185   : > { %1775 = vrcp.f32 %v2461_v4  ;;  %v1169_v58 = vmul.f32 %v2466_v2, %v1168_v19  ;;  %v1178_v15 = vor.u32 1.1754944e-38, %v1177_v17  ;;  %vm1186_vm7 = vweird.f32 %v2441_v40 }
 0x186   : > { %v1087_v53 = vrot.slane %v1022_v39, 4  ;;  %vm1172_vm9 = vweird.f32 %v2466_v2  ;;  %v1183_v50 = vsub.f32 1.0, %v1182_v29  ;;  %v1207_v16 = vand.u32 2147483648, %v2449_v5 }
 0x187   : > { %v903_v38 = vadd.f32 %v902_v61, %v901_v54  ;;  %v1190_v24 = vand.u32 2147483647, %v2441_v40  ;;  %v1170_v26 = vadd.f32 %v2466_v2, %v1169_v58  ;;  %v2528_v43 = vor.u32 1.1754944e-38, %v1192_v7  ;;  %vm2537_vm0 = vmor %vm1171_vm3, %vm1172_vm9 }
 0x188   : > { %v1089_v0 = vsel %vm1088_vm11, %v1087_v53, %v1086_v1  ;;  %vm1201_vm15 = vweird.f32 %v2449_v5  ;;  %v1205_v28 = vand.u32 2147483647, %v2449_v5  ;;  %vm1187_vm1 = vweird.f32 %v2488_v11 }
 0x189   : > { %v1092_v35 = vsel %vm2876_vm12, %v1090_v49, %v1089_v0  ;;  %v2515_v49 = vpop.eup %1773  ;;  %1777 = vrcp.f32 %v2464_v6  ;;  %v1184_v60 = vmul.f32 %v2488_v11, %v1183_v50  ;;  %v2548_v56 = vor.u32 1.1754944e-38, %v1207_v16 }
 0x18a   : > { %v1095_v25 = vsel %vm2875_vm13, %v1093_v48, %v1092_v35  ;;  %v1164_v48 = vsel %vm2490_vm2, %v1163_v18, %v1159_v20  ;;  %v1197_v59 = vmul.f32 %v2515_v49, %v2449_v5  ;;  %vm1216_vm2 = vweird.f32 %v2461_v4 }
 0x18b   : > { %v2518_v36 = vsel %vm2874_vm14, %v1096_v44, %v1095_v25  ;;  %v2545_v57 = vpop.eup %1775  ;;  %v1220_v34 = vand.u32 2147483647, %v2461_v4  ;;  %vm2554_vm3 = vcmp.eq.f32.partialorder %v1190_v24, 8.507059e+37  ;;  %v1222_v51 = vand.u32 2147483648, %v2461_v4  ;;  %vm2586_vm14 = vmor %vm1186_vm7, %vm1187_vm1 }
 0x18c   : > { %v1100_v47 = vmul.f32 %v2518_v36, %v2083_v41  ;;  %v1235_v30 = vand.u32 2147483647, %v2464_v6  ;;  %v1174_v42 = vsel %vm2537_vm0, %v2466_v2, %v1170_v26  ;;  %vm1231_vm9 = vweird.f32 %v2464_v6 }
 0x18d   : > { %v1198_v12 = vsub.f32 1.0, %v1197_v59  ;;  %vm2570_vm5 = vcmp.eq.f32.partialorder %v1205_v28, 8.507059e+37  ;;  %v1212_v53 = vmul.f32 %v2545_v57, %v2461_v4  ;;  %v1185_v2 = vadd.f32 %v2488_v11, %v1184_v60 }
 0x18e   : > { %v2533_v37 = vmul.f32 %v1100_v47, %v2518_v36  ;;  %vm1202_vm0 = vweird.f32 %v2515_v49  ;;  %vm1217_vm13 = vweird.f32 %v2545_v57  ;;  %vm2591_vm12 = vcmp.eq.f32.partialorder %v1220_v34, 8.507059e+37 }
 0x18f   : > { %v1778_v45 = vpop.eup %1777  ;;  %v1223_v61 = vor.u32 1.1754944e-38, %v1222_v51  ;;  %v1199_v29 = vmul.f32 %v2515_v49, %v1198_v12  ;;  %v1213_v35 = vsub.f32 1.0, %v1212_v53  ;;  %vm2613_vm7 = vmor %vm1201_vm15, %vm1202_vm0  ;;  %1779 = vrcp.f32 %v2469_v9 }
 0x190   : > { %v1103_v31 = vrot.slane %v2533_v37, 1  ;;  %v1104_v46 = vrot.slane %v2533_v37, 2  ;;  %v1105_v54 = vrot.slane %v2533_v37, 3  ;;  %v1106_v62 = vrot.slane %v2533_v37, 4 }
 0x191   : > { %v1118_v3 = vsub.f32 %v2323_v14, %v2533_v37  ;;  %v1107_v39 = vrot.slane %v2533_v37, 5  ;;  %v1108_v14 = vrot.slane %v2533_v37, 6  ;;  %v1109_v21 = vrot.slane %v2533_v37, 7 }
 0x192   : > { %v1119_v23 = vsub.f32 %v2332_v22, %v1103_v31  ;;  %v1120_v10 = vsub.f32 %v2401_v52, %v1104_v46  ;;  %v1179_v22 = vsel %vm2504_vm6, %v1178_v15, %v1174_v42  ;;  %v1121_v18 = vsub.f32 %v2420_v32, %v1105_v54 }
 0x193   : > { %v1122_v0 = vsub.f32 %v903_v38, %v1106_v62  ;;  %v1126_v44 = vmax.f32 %v1118_v3, 0.0  ;;  %v1123_v19 = vsub.f32 %v2326_v8, %v1107_v39  ;;  %vm2599_vm6 = vcmp.eq.f32.partialorder %v1235_v30, 8.507059e+37 }
 0x194   : > { %v1127_v40 = vmax.f32 %v1119_v23, 0.0  ;;  %v2604_v33 = vsub.f32 %v2364_v13, %v1108_v14  ;;  %v1128_v7 = vmax.f32 %v1120_v10, 0.0  ;;  %v1189_v32 = vsel %vm2586_vm14, %v2488_v11, %v1185_v2  ;;  %vm2626_vm14 = vmor %vm1216_vm2, %vm1217_vm13 }
 0x195   : > { %v1227_v25 = vmul.f32 %v1778_v45, %v2464_v6  ;;  %v1200_v58 = vadd.f32 %v2515_v49, %v1199_v29  ;;  %v1214_v13 = vmul.f32 %v2545_v57, %v1213_v35  ;;  %v1237_v15 = vand.u32 2147483648, %v2464_v6  ;;  %v1780_v31 = vpop.eup %1779 }
 0x196   : > { %v1129_v50 = vmax.f32 %v1121_v18, 0.0  ;;  %v1165_v11 = vmul.f32 %v1164_v48, %v1126_v44  ;;  %vm1232_vm15 = vweird.f32 %v1778_v45  ;;  %v1180_v38 = vmul.f32 %v1179_v22, %v1127_v40 }
 0x197   : > { %v1228_v16 = vsub.f32 1.0, %v1227_v25  ;;  %v1204_v47 = vsel %vm2613_vm7, %v2515_v49, %v1200_v58  ;;  %v1215_v24 = vadd.f32 %v2545_v57, %v1214_v13  ;;  %1781 = vrcp.f32 %v2475_v27  ;;  %vm2646_vm13 = vmor %vm1231_vm9, %vm1232_vm15  ;;  %v1695_v58 = vld [vmem:[%s2869_s7 + $0x38] sm:$0xff] }
 0x198   : > { %v2636_v48 = vsub.f32 %v2411_v55, %v1109_v21  ;;  %v1130_v26 = vmax.f32 %v1122_v0, 0.0  ;;  %v1194_v4 = vsel %vm2554_vm3, %v2528_v43, %v1189_v32  ;;  %v1131_v37 = vmax.f32 %v1123_v19, 0.0  ;;  %1490 = vmatpush.bf16.msrb.mxu3 %v1695_v58 }
 0x199   : > { %v1229_v28 = vmul.f32 %v1778_v45, %v1228_v16  ;;  %v1195_v41 = vmul.f32 %v1194_v4, %v1128_v7  ;;  %v1219_v59 = vsel %vm2626_vm14, %v2545_v57, %v1215_v24  ;;  %v1238_v55 = vor.u32 1.1754944e-38, %v1237_v15 }
 0x19a   : > { %v1209_v60 = vsel %vm2570_vm5, %v2548_v56, %v1204_v47  ;;  %vm1246_vm1 = vweird.f32 %v2469_v9  ;;  %v2654_v43 = vadd.f32 1e-31, %v1165_v11  ;;  %v1224_v57 = vsel %vm2591_vm12, %v1223_v61, %v1219_v59 }
 0x19b   : > { %v1230_v34 = vadd.f32 %v1778_v45, %v1229_v28  ;;  %v1210_v46 = vmul.f32 %v1209_v60, %v1129_v50  ;;  %v1250_v6 = vand.u32 2147483647, %v2469_v9  ;;  %v2659_v1 = vadd.f32 1e-31, %v1180_v38  ;;  %v1694_v38 = vld [vmem:[%s2869_s7 + $0x30] sm:$0xff] }
 0x19c   : > { %v1225_v51 = vmul.f32 %v1224_v57, %v1130_v26  ;;  %v1242_v56 = vmul.f32 %v1780_v31, %v2469_v9  ;;  %v1252_v54 = vand.u32 2147483648, %v2469_v9  ;;  %vm1261_vm5 = vweird.f32 %v2475_v27  ;;  %1491 = vmatpush.bf16.msrb.mxu3 %v1694_v38  ;;  %v1693_v57 = vld [vmem:[%s2869_s7 + $0x28] sm:$0xff] }
 0x19d   : > { %v1234_v30 = vsel %vm2646_vm13, %v1778_v45, %v1230_v34  ;;  %v1782_v62 = vpop.eup %1781  ;;  %v1265_v3 = vand.u32 2147483647, %v2475_v27  ;;  %v2667_v42 = vadd.f32 1e-31, %v1195_v41  ;;  %1783 = vrsqrt.f32 %v2654_v43 }
 0x19e   : > { %v1239_v39 = vsel %vm2599_vm6, %v1238_v55, %v1234_v30  ;;  %v1243_v23 = vsub.f32 1.0, %v1242_v56  ;;  %vm1247_vm12 = vweird.f32 %v1780_v31  ;;  %v1257_v12 = vmul.f32 %v1782_v62, %v2475_v27 }
 0x19f   : > { %v1240_v63 = vmul.f32 %v1239_v39, %v1131_v37  ;;  %v1267_v53 = vand.u32 2147483648, %v2475_v27  ;;  %v2674_v14 = vadd.f32 1e-31, %v1210_v46  ;;  %1785 = vrsqrt.f32 %v2659_v1  ;;  %vm2682_vm3 = vmor %vm1246_vm1, %vm1247_vm12 }
 0x1a0   : > { %v1244_v10 = vmul.f32 %v1780_v31, %v1243_v23  ;;  %v1258_v2 = vsub.f32 1.0, %v1257_v12  ;;  %vm1262_vm2 = vweird.f32 %v1782_v62  ;;  %v2677_v45 = vadd.f32 1e-31, %v1225_v51  ;;  %v1418_v23 = vld [vmem:[%s396_s20] sm:$0xff]  ;;  %1492 = vmatpush.bf16.msrb.mxu3 %v1693_v57 }
 0x1a1   : > { %v1132_v22 = vmax.f32 %v2604_v33, 0.0  ;;  %v1253_v52 = vor.u32 1.1754944e-38, %v1252_v54  ;;  %1787 = vrsqrt.f32 %v2667_v42  ;;  %v1133_v61 = vmax.f32 %v2636_v48, 0.0  ;;  %vm2690_vm0 = vmor %vm1261_vm5, %vm1262_vm2 }
 0x1a2   : > { %v1245_v21 = vadd.f32 %v1780_v31, %v1244_v10  ;;  %vm1251_vm9 = vcmp.eq.f32.partialorder %v1250_v6, 8.507059e+37  ;;  %v1259_v18 = vmul.f32 %v1782_v62, %v1258_v2  ;;  %vm2694_vm6 = vcmp.eq.f32.partialorder %v1265_v3, 8.507059e+37 }
 0x1a3   : > { %v1784_v0 = vpop.eup %1783  ;;  %v1268_v19 = vor.u32 1.1754944e-38, %v1267_v53  ;;  %v2698_v40 = vadd.f32 1e-31, %v1240_v63  ;;  %1789 = vrsqrt.f32 %v2674_v14  ;;  %vm1286_vm7 = vcmp.eq.f32.partialorder %v2654_v43, inf }
 0x1a4   : > { %v1249_v29 = vsel %vm2682_vm3, %v1780_v31, %v1245_v21  ;;  %v1260_v35 = vadd.f32 %v1782_v62, %v1259_v18  ;;  %v1280_v20 = vmul.f32 %v1784_v0, %v2654_v43  ;;  %1791 = vrsqrt.f32 %v2677_v45 }
 0x1a5   : > { %v1786_v27 = vpop.eup %1785  ;;  %v1254_v33 = vsel %vm1251_vm9, %v1253_v52, %v1249_v29  ;;  %1793 = vrsqrt.f32 %v2698_v40  ;;  %vm1288_vm14 = vcmp.eq.f32.partialorder %v2654_v43, 0.0  ;;  %v1289_v24 = vand.u32 2147483648, %v2654_v43  ;;  %v1419_v52 = vld [vmem:[%s2870_s8] sm:$0x3] }
 0x1a6   : > { %v1255_v7 = vmul.f32 %v1254_v33, %v1132_v22  ;;  %v1264_v32 = vsel %vm2690_vm0, %v1782_v62, %v1260_v35  ;;  %v1281_v8 = vmul.f32 %v1784_v0, %v1280_v20  ;;  %v1292_v25 = vmul.f32 %v1786_v27, %v2659_v1 }
 0x1a7   : > { %v1788_v13 = vpop.eup %1787  ;;  %v1269_v15 = vsel %vm2694_vm6, %v1268_v19, %v1264_v32  ;;  %vm1298_vm15 = vcmp.eq.f32.partialorder %v2659_v1, inf  ;;  %vm1300_vm13 = vcmp.eq.f32.partialorder %v2659_v1, 0.0  ;;  %v1301_v59 = vand.u32 2147483648, %v2659_v1 }
 0x1a8   : > { %v1270_v50 = vmul.f32 %v1269_v15, %v1133_v61  ;;  %v2715_v11 = vadd.f32 1e-31, %v1255_v7  ;;  %v1282_v5 = vmul.f32 0.5, %v1281_v8  ;;  %v1293_v16 = vmul.f32 %v1786_v27, %v1292_v25  ;;  %v1692_v61 = vld [vmem:[%s2869_s7 + $0x20] sm:$0xff]  ;;  %v1691_v15 = vld [vmem:[%s2869_s7 + $0x18] sm:$0xff] }
 0x1a9   : > { %v1790_v47 = vpop.eup %1789  ;;  %v1304_v48 = vmul.f32 %v1788_v13, %v2667_v42  ;;  %vm1310_vm1 = vcmp.eq.f32.partialorder %v2667_v42, inf  ;;  %v1313_v31 = vand.u32 2147483648, %v2667_v42  ;;  %vm1312_vm5 = vcmp.eq.f32.partialorder %v2667_v42, 0.0  ;;  %1493 = vmatpush.bf16.msrb.mxu3 %v1692_v61 }
 0x1aa   : > { %v1792_v26 = vpop.eup %1791  ;;  %v2724_v4 = vadd.f32 1e-31, %v1270_v50  ;;  %v1283_v28 = vsub.f32 1.5, %v1282_v5  ;;  %v1294_v37 = vmul.f32 0.5, %v1293_v16  ;;  %v1316_v41 = vmul.f32 %v1790_v47, %v2674_v14 }
 0x1ab   : > { %v1305_v49 = vmul.f32 %v1788_v13, %v1304_v48  ;;  %v1328_v55 = vmul.f32 %v1792_v26, %v2677_v45  ;;  %1795 = vrsqrt.f32 %v2715_v11  ;;  %v1794_v6 = vpop.eup %1793  ;;  %vm1322_vm12 = vcmp.eq.f32.partialorder %v2674_v14, inf }
 0x1ac   : > { %v1284_v60 = vmul.f32 %v1784_v0, %v1283_v28  ;;  %v1295_v34 = vsub.f32 1.5, %v1294_v37  ;;  %v1317_v46 = vmul.f32 %v1790_v47, %v1316_v41  ;;  %v1325_v30 = vand.u32 2147483648, %v2674_v14 }
 0x1ad   : > { %v1306_v51 = vmul.f32 0.5, %v1305_v49  ;;  %v1329_v56 = vmul.f32 %v1792_v26, %v1328_v55  ;;  %1797 = vrsqrt.f32 %v2724_v4  ;;  %vm1324_vm2 = vcmp.eq.f32.partialorder %v2674_v14, 0.0  ;;  %1494 = vmatpush.bf16.msrb.mxu3 %v1691_v15 }
 0x1ae   : > { %v1285_v54 = vmul.f32 %v1284_v60, %v2654_v43  ;;  %v1296_v62 = vmul.f32 %v1786_v27, %v1295_v34  ;;  %v1318_v3 = vmul.f32 0.5, %v1317_v46  ;;  %vm1334_vm3 = vcmp.eq.f32.partialorder %v2677_v45, inf }
 0x1af   : > { %v1340_v39 = vmul.f32 %v1794_v6, %v2698_v40  ;;  %v1307_v12 = vsub.f32 1.5, %v1306_v51  ;;  %v1330_v63 = vmul.f32 0.5, %v1329_v56  ;;  %vm1336_vm9 = vcmp.eq.f32.partialorder %v2677_v45, 0.0 }
 0x1b0   : > { %v1337_v53 = vand.u32 2147483648, %v2677_v45  ;;  %vm1425_vm0 = vcmask 1041408   ;;  %v1287_v10 = vsel %vm1286_vm7, %v2654_v43, %v1285_v54  ;;  %v1297_v2 = vmul.f32 %v1296_v62, %v2659_v1  ;;  %v1689_v62 = vld [vmem:[%s2869_s7 + $0x8] sm:$0xff] }
 0x1b1   : > { %v1319_v22 = vsub.f32 1.5, %v1318_v3  ;;  %v1341_v17 = vmul.f32 %v1794_v6, %v1340_v39  ;;  %v1796_v21 = vpop.eup %1795  ;;  %v1290_v18 = vsel %vm1288_vm14, %v1289_v24, %v1287_v10  ;;  %v1308_v0 = vmul.f32 %v1788_v13, %v1307_v12 }
 0x1b2   : > { %v1331_v44 = vsub.f32 1.5, %v1330_v63  ;;  %vm1346_vm6 = vcmp.eq.f32.partialorder %v2698_v40, inf  ;;  %v1420_v9 = vpack.c.bf16 %v1418_v23, %v1418_v23  ;;  %v1299_v19 = vsel %vm1298_vm15, %v2659_v1, %v1297_v2 }
 0x1b3   : > { %v1320_v29 = vmul.f32 %v1790_v47, %v1319_v22  ;;  %v1342_v35 = vmul.f32 0.5, %v1341_v17  ;;  %v1352_v20 = vmul.f32 %v1796_v21, %v2715_v11  ;;  %v1798_v27 = vpop.eup %1797  ;;  %v1302_v33 = vsel %vm1300_vm13, %v1301_v59, %v1299_v19  ;;  %v1688_v22 = vld [vmem:[%s2869_s7] sm:$0xff] }
 0x1b4   : > { %v1309_v43 = vmul.f32 %v1308_v0, %v2667_v42  ;;  %v1332_v7 = vmul.f32 %v1792_v26, %v1331_v44  ;;  %v1427_v32 = vsel %vm1425_vm0, %v1419_v52, 0  ;;  %v1364_v13 = vmul.f32 %v1798_v27, %v2724_v4 }
 0x1b5   : > { %v1321_v8 = vmul.f32 %v1320_v29, %v2674_v14  ;;  %v1343_v25 = vsub.f32 1.5, %v1342_v35  ;;  %v1353_v58 = vmul.f32 %v1796_v21, %v1352_v20  ;;  %1436 = vmatpush.bf16.msrb.mxu2 %v1427_v32  ;;  %v1383_v5 = vrot.slane %v1302_v33, 7 }
 0x1b6   : > { %v1311_v1 = vsel %vm1310_vm1, %v2667_v42, %v1309_v43  ;;  %v1333_v50 = vmul.f32 %v1332_v7, %v2677_v45  ;;  %vm1421_vm7 = vcmask 31744   ;;  %v1365_v28 = vmul.f32 %v1798_v27, %v1364_v13 }
 0x1b7   : > { %v1314_v16 = vsel %vm1312_vm5, %v1313_v31, %v1311_v1  ;;  %v1323_v38 = vsel %vm1322_vm12, %v2674_v14, %v1321_v8  ;;  %v1344_v47 = vmul.f32 %v1794_v6, %v1343_v25  ;;  %v1354_v24 = vmul.f32 0.5, %v1353_v58  ;;  %v1690_v14 = vld [vmem:[%s2869_s7 + $0x10] sm:$0xff] }
 0x1b8   : > { %v1326_v48 = vsel %vm1324_vm2, %v1325_v30, %v1323_v38  ;;  %v1335_v26 = vsel %vm1334_vm3, %v2677_v45, %v1333_v50  ;;  %v1384_v37 = vsel %vm1079_vm4, %v1383_v5, %v1290_v18  ;;  %1647 = vmatmul.msk.bf16.vlgmr.msrb.gmra.mxu2 %vm1421_vm7, %v1420_v9  ;;  %v1385_v49 = vrot.slane %v1314_v16, 6  ;;  %1495 = vmatpush.bf16.msrb.mxu3 %v1690_v14 }
 0x1b9   : > { %v1338_v42 = vsel %vm1336_vm9, %v1337_v53, %v1335_v26  ;;  %v1345_v41 = vmul.f32 %v1344_v47, %v2698_v40  ;;  %v1355_v59 = vsub.f32 1.5, %v1354_v24  ;;  %vm1348_vm14 = vcmp.eq.f32.partialorder %v2698_v40, 0.0 }
 0x1ba   : > { %v1349_v55 = vand.u32 2147483648, %v2698_v40  ;;  %v1366_v60 = vmul.f32 0.5, %v1365_v28  ;;  %v1387_v34 = vrot.slane %v1326_v48, 5  ;;  %v1386_v46 = vsel %vm1082_vm8, %v1385_v49, %v1384_v37 }
 0x1bb   : > { %v1347_v45 = vsel %vm1346_vm6, %v2698_v40, %v1345_v41  ;;  %v1356_v31 = vmul.f32 %v1796_v21, %v1355_v59  ;;  %v1389_v57 = vrot.slane %v1338_v42, 4  ;;  %vm1358_vm4 = vcmp.eq.f32.partialorder %v2715_v11, inf }
 0x1bc   : > { %v1350_v6 = vsel %vm1348_vm14, %v1349_v55, %v1347_v45  ;;  %v1367_v51 = vsub.f32 1.5, %v1366_v60  ;;  %v1388_v30 = vsel %vm1085_vm10, %v1387_v34, %v1386_v46  ;;  %v1361_v40 = vand.u32 2147483648, %v2715_v11  ;;  %1496 = vmatpush.bf16.msrb.mxu3 %v1689_v62 }
 0x1bd   : > { %v1357_v56 = vmul.f32 %v1356_v31, %v2715_v11  ;;  %v1390_v54 = vsel %vm1088_vm11, %v1389_v57, %v1388_v30  ;;  %v1391_v39 = vrot.slane %v1350_v6, 3  ;;  %vm1360_vm8 = vcmp.eq.f32.partialorder %v2715_v11, 0.0 }
 0x1be   : > { %v1368_v3 = vmul.f32 %v1798_v27, %v1367_v51  ;;  %vm2941_vm10 = vcmask 1045509   ;;  %vm1370_vm11 = vcmp.eq.f32.partialorder %v2724_v4, inf  ;;  %v1373_v10 = vand.u32 2147483648, %v2724_v4 }
 0x1bf   : > { %v1359_v23 = vsel %vm1358_vm4, %v2715_v11, %v1357_v56  ;;  %v1392_v53 = vsel %vm2941_vm10, %v1391_v39, %v1390_v54  ;;  %vm1372_vm15 = vcmp.eq.f32.partialorder %v2724_v4, 0.0  ;;  %vm2942_vm13 = vcmask 1046534  }
 0x1c0   : > { %v1362_v12 = vsel %vm1360_vm8, %v1361_v40, %v1359_v23  ;;  %v1369_v63 = vmul.f32 %v1368_v3, %v2724_v4  ;;  %1497 = vmatpush.bf16.msrb.mxu3 %v1688_v22  ;;  %vm2943_vm1 = vcmask 1047559   ;;  %vm2944_vm5 = vcmask 523264  }
 0x1c1   : > { %v1393_v2 = vrot.slane %v1362_v12, 2 }
 0x1c2   : > { %v1371_v17 = vsel %vm1370_vm11, %v2724_v4, %v1369_v63  ;;  %v1750_v4 = vld [vmem:[%s2871_s9] ss:$0 sm:$0xff] }
 0x1c3   : > { %v1374_v11 = vsel %vm1372_vm15, %v1373_v10, %v1371_v17  ;;  %v1394_v52 = vsel %vm2942_vm13, %v1393_v2, %v1392_v53 }
 0x1c4   : > { %v1395_v61 = vrot.slane %v1374_v11, 1 }
 0x1c6   : > { %v1396_v21 = vsel %vm2943_vm1, %v1395_v61, %v1394_v52 }
 0x1c7   : > { %1397 = vrot.lane.b32.xlu1 %v1396_v21, %s1863_s21  ;;  %s1510_s21 = scalar_lea.sflag [#allocation3], %s379_s27 }
 0x239   : > { %v1398_v18 = vpop.permute.xlu1 %1397 }
 0x23a   : > { %v1400_v0 = vsel %vm2944_vm5, %v2518_v36, %v1398_v18 }
 0x23b   : > { %v1417_v44 = vpack.c.bf16 %v1400_v0, %v1400_v0  ;;  %v1438_v9 = vpop.f32.mrf.mxu2 }
 0x23d   : > { %1498 = vmatmul.bf16.vlgmr.msrb.gmra.mxu3 %v1417_v44 }
 0x243   : > { %v1440_v19 = vpop.f32.mrf.mxu2 }
 0x2c0   : > { %v1499_v29 = vpop.f32.mrf.mxu3 }
 0x2c1   : > { %v1500_v36 = vadd.f32 %v1499_v29, %v1438_v9 }
 0x2c3   : > { %v1507_v35 = vadd.f32 %v1750_v4, %v1500_v36 }
 0x2c5   : > { %1508 = vst [vmem:[%s381_s25] sm:$0xff] %v1507_v35 }
 0x2c6   : > { %1826 = shalt.err (!%p1823_p4)
}
 0x2c7   : > { %1699 = dma.vmem_to_hbm [thread:$0]  (%p1957_p5), %s1523_s26, 128, %s1525_s17, %s1510_s21  }
 0x2c8   : > { %v1501_v20 = vpop.f32.mrf.mxu3 }
 0x2c9 PF: > { %p1705_p7 = scmp.ge.s32.totalorder %s1861_s16, 2  ;;  %s1536_s27 = sand.u32 1, %s1849_s13  }
 0x2ca   : > { %s1537_s12 = scalar_lea.sflag [#allocation3], %s1536_s27 }
 0x2cb   : > { %p1702_p8 = pnand %p1705_p7, %p1961_p6 }
 0x2cd   : > { %p1703_p9 = pneg %p1702_p8 }
 0x2cf   : > { %1844 = dma.done.wait (%p1703_p9), %s1537_s12, 128  }
 0x2d0   : > { %1846 = vsyncadd (%p1703_p9), %s1537_s12, 4294967168  ;;  %p20_p10 = scmp.ge.s32.totalorder %s1944_s19, 5   ;;  %s2945_s13 = smov %s1853_s14 }
 0x2d1   : > { %s2946_s14 = smov %s1857_s15  ;;  %s2947_s15 = smov %s1955_s22 }
 0x2d2   : > { %s2948_s16 = smov %s1944_s19  ;;  %22 = sbr.rel (!%p20_p10) target bundleno = 6 (0x6), region = 101 }
 0x2d7   :  { %1543 = vsyncpa [#allocation3], 1 }
 0x2d8   :  { %1545 = vsyncpa [#allocation3 + $0x1], 1 }

</bundles_post_ra>
